<compile_context>
chip_gen: v6e
topology: v6e:2x2x1
jax: 0.10.0
libtpu: 0.0.40
codegen_flags: <defaults>
</compile_context>

<pallas_src>
import functools

import jax
import jax.numpy as jnp
from jax import lax
from jax.experimental import pallas as pl
from jax.experimental.pallas import tpu as pltpu

_LANE = 128


def _cascade_kernel(x_ref, wall_ref, bf_ref, wc_ref, bc_ref, o_ref, *,
                    compute_dtype, approx_softmax):
    """Full cascade for one block of batch elements.

    Shapes (all lane-padded in the wrapper):
      x_ref   : (H, Bb, T, hd_p)   per-head input chunks, head axis leading
      wall_ref: (hd_p, 4*hd_p)     packed [q*scale | k1 | v | fusion] projection
      bf_ref  : (1, hd_p)          fusion bias
      wc_ref  : (H, hd_p, D_p)     per-head slices of the 1x1 conv weight
      bc_ref  : (1, D_p)           1x1 conv bias
      o_ref   : (Bb, T, D_p)
    """
    H, Bb, T, hd_p = x_ref.shape
    D_p = o_ref.shape[-1]
    rows = Bb * T

    wall = wall_ref[...]                      # compute_dtype
    bf = bf_ref[...]                          # f32
    bc = bc_ref[...]                          # f32

    # Accumulator for relu(cat(feats)) @ Wc + bc; broadcast hoisted out of the loop.
    acc0 = jnp.broadcast_to(bc, (rows, D_p)).astype(jnp.float32)
    feat0 = jnp.zeros((rows, hd_p), jnp.float32)

    def head_body(i, carry):
        feat, acc = carry
        # feats_in[i]; for i == 0 the carry is zero, so the add is uniform.
        feat = feat + x_ref[i].reshape(rows, hd_p).astype(jnp.float32)

        # One packed MXU matmul per head: [q*scale | k1 | v | (y2 - bf)] = feat @ W_all.
        proj = jnp.dot(feat.astype(compute_dtype), wall,
                       preferred_element_type=jnp.float32)        # (rows, 4*hd_p)
        q = proj[:, 0 * hd_p:1 * hd_p]        # attention scale folded into Wq
        k1 = proj[:, 1 * hd_p:2 * hd_p]
        v = proj[:, 2 * hd_p:3 * hd_p]
        y2 = proj[:, 3 * hd_p:4 * hd_p] + bf

        # Per-batch attention; einsums contract hd_p so no transpose materializes.
        q3 = q.reshape(Bb, T, hd_p).astype(compute_dtype)
        y3 = y2.reshape(Bb, T, hd_p).astype(compute_dtype)
        v3 = v.reshape(Bb, T, hd_p).astype(compute_dtype)
        # TODO(synk): key-block + online softmax for production T to bound VMEM.
        s = jnp.einsum('bqd,bkd->bqk', q3, y3,
                       preferred_element_type=jnp.float32)        # (Bb, T, T) f32
        s = s - jnp.max(s, axis=-1, keepdims=True)
        p = jnp.exp(s)                                            # f32 elementwise
        denom = jnp.sum(p, axis=-1, keepdims=True)                # (Bb, T, 1)
        pv = jnp.einsum('bqk,bkd->bqd', p.astype(compute_dtype), v3,
                        preferred_element_type=jnp.float32)       # (Bb, T, hd_p)
        # Normalize AFTER the PV matmul: (Bb,T,hd_p) multiply instead of (Bb,T,T).
        if approx_softmax:
            k2 = pv * pl.reciprocal(denom, approx=True)           # EUP slot
        else:
            k2 = pv / denom

        feat = k1 + k2.reshape(rows, hd_p)

        # Fused ReLU + 1x1-conv contribution of this head's output slice.
        acc = acc + jnp.dot(jnp.maximum(feat, 0.0).astype(compute_dtype),
                            wc_ref[i], preferred_element_type=jnp.float32)
        return feat, acc

    # Unrolled fori_loop bounds per-head live ranges, keeps LLO visibility.
    _, acc = lax.fori_loop(0, H, head_body, (feat0, acc0), unroll=True)

    o_ref[...] = acc.reshape(Bb, T, D_p).astype(o_ref.dtype)      # lane-dense store


def _round_up(n, m):
    return ((n + m - 1) // m) * m


def _vmem_capacity_bytes():
    try:
        return int(pltpu.get_tpu_info().vmem_capacity_bytes)
    except Exception:
        return 64 * 1024 * 1024          # conservative: v7x per-TensorCore VMEM


def _pick_block_b(B, T, H, hd_p, D_p, x_bytes, cdt_bytes, budget):
    """Largest batch block that (a) keeps grid >= 2 when B >= 2 (v7x: 2 TCs) and
    (b) keeps double-buffered I/O blocks + live intermediates under `budget`."""
    def est(bb):
        rows = bb * T
        io = 2 * H * rows * hd_p * x_bytes + 2 * rows * D_p * 4
        weights = 4 * hd_p * hd_p * cdt_bytes + H * hd_p * D_p * cdt_bytes \
            + 4 * (hd_p + D_p)
        live = (rows * 4 * hd_p * 4                 # packed projection
                + 2 * bb * T * T * 4                # score + exp(score)
                + 3 * rows * hd_p * cdt_bytes       # MXU ingest casts
                + 2 * rows * hd_p * 4               # feat, k2
                + rows * D_p * 4)                   # conv accumulator
        return io + weights + live

    divisors = [d for d in range(1, B + 1) if B % d == 0]
    cand = [d for d in divisors if est(d) <= budget and (B // d >= 2 or B == 1)]
    if not cand:
        return 1
    target_rows = 1024                              # enough M for a 256-wide MXU
    good = [d for d in cand if d * T <= max(target_rows, T)]
    return max(good) if good else min(cand)


def cascaded_cfa(x, params, num_heads, *, block_b=None,
                 compute_dtype=jnp.bfloat16, approx_softmax=True):
    """Cascaded contextual-fusion attention forward pass.

    params = (wq, wk, wv, wfk, wfx, bf, wc, bc), matmul weights in (in, out) layout.
    """
    B, T, D = x.shape
    assert D % num_heads == 0, (D, num_heads)
    hd = D // num_heads
    wq, wk, wv, wfk, wfx, bf, wc, bc = params

    hd_p = _round_up(hd, _LANE)                     # lane-aligned head dim
    D_p = num_heads * hd_p                          # lane-dense output width
    pad_h = hd_p - hd
    scale = float(hd) ** -0.5

    # ---- one-time wrapper-side weight packing (all zero-padded to lane tiles) ----
    # fusion(cat(k1, feat)) == feat @ (Wk @ Wf_k + Wf_x) + bf   since k1 = feat @ Wk
    wf_eff = jnp.dot(wk, wfk, preferred_element_type=jnp.float32) + wfx

    def _pad_sq(w):                                 # (hd, hd) -> (hd_p, hd_p)
        return jnp.pad(w, ((0, pad_h), (0, pad_h)))

    # Packed [q*scale | k1 | v | fusion]; attention scale folded into the q columns.
    w_all = jnp.concatenate(
        [_pad_sq(wq * scale), _pad_sq(wk), _pad_sq(wv), _pad_sq(wf_eff)],
        axis=1).astype(compute_dtype)                                  # (hd_p, 4*hd_p)
    bf_p = jnp.pad(bf.astype(jnp.float32), ((0, 0), (0, pad_h)))       # (1, hd_p)
    wc_p = jnp.pad(wc.reshape(num_heads, hd, D),
                   ((0, 0), (0, pad_h), (0, D_p - D))).astype(compute_dtype)
    bc_p = jnp.pad(bc.astype(jnp.float32), ((0, 0), (0, D_p - D)))     # (1, D_p)

    # Input presented head-major & lane-padded: (H, B, T, hd_p).  Zero tails stay
    # exactly zero through the whole cascade (all padded weight rows/cols are 0).
    x_p = jnp.pad(x.reshape(B, T, num_heads, hd),
                  ((0, 0), (0, 0), (0, 0), (0, pad_h)))
    x_p = jnp.transpose(x_p, (2, 0, 1, 3))

    cap = _vmem_capacity_bytes()                    # per-generation VMEM sizing
    if block_b is None:
        block_b = _pick_block_b(B, T, num_heads, hd_p, D_p,
                                x.dtype.itemsize,
                                jnp.dtype(compute_dtype).itemsize,
                                budget=int(0.45 * cap))
    assert B % block_b == 0, (B, block_b)

    kernel = functools.partial(_cascade_kernel, compute_dtype=compute_dtype,
                               approx_softmax=approx_softmax)

    out_p = pl.pallas_call(
        kernel,
        out_shape=jax.ShapeDtypeStruct((B, T, D_p), x.dtype),
        grid=(B // block_b,),
        in_specs=[
            pl.BlockSpec((num_heads, block_b, T, hd_p), lambda b: (0, b, 0, 0)),  # x
            pl.BlockSpec((hd_p, 4 * hd_p), lambda b: (0, 0)),        # packed W_all
            pl.BlockSpec((1, hd_p), lambda b: (0, 0)),               # fusion bias
            pl.BlockSpec((num_heads, hd_p, D_p), lambda b: (0, 0, 0)),  # conv weight
            pl.BlockSpec((1, D_p), lambda b: (0, 0)),                # conv bias
        ],
        out_specs=pl.BlockSpec((block_b, T, D_p), lambda b: (b, 0, 0)),
        compiler_params=pltpu.CompilerParams(
            dimension_semantics=("parallel",),
            vmem_limit_bytes=int(0.75 * cap),       # ~48 MiB v7x, ~96 MiB v5e/v6e
        ),
    )(x_p, w_all, bf_p, wc_p, bc_p)

    return out_p[..., :D]                           # drop lane padding


def reference(x, params, num_heads):
    """Pure-JAX f32 reference reproducing the PyTorch forward."""
    wq, wk, wv, wfk, wfx, bf, wc, bc = params
    B, T, D = x.shape
    hd = D // num_heads

    feats_in = [x[:, :, i * hd:(i + 1) * hd] for i in range(num_heads)]
    feats_out = []
    feat = feats_in[0]
    for i in range(num_heads):
        if i > 0:
            feat = feat + feats_in[i]
        q = feat @ wq
        k1 = feat @ wk
        v = feat @ wv
        y2 = k1 @ wfk + feat @ wfx + bf
        att = jnp.einsum('btd,bsd->bts', q, y2) * (hd ** -0.5)
        att = jax.nn.softmax(att, axis=-1)
        k2 = att @ v
        feat = k1 + k2
        feats_out.append(feat)
    cat = jnp.concatenate(feats_out, axis=-1)        # (B, T, D)
    return jnp.maximum(cat, 0.0) @ wc + bc           # ReLU + 1x1 conv + bias


if __name__ == "__main__":
    # Small shapes consistent with the module: dim divisible by num_heads.
    B, T, D, H = 2, 8, 32, 4
    hd = D // H

    key = jax.random.PRNGKey(0)
    ks = jax.random.split(key, 9)
    x = jax.random.normal(ks[0], (B, T, D), jnp.float32)

    # Deterministic synthetic parameters ((in, out) layout for all matmul weights).
    wq = 0.30 * jax.random.normal(ks[1], (hd, hd), jnp.float32)
    wk = 0.30 * jax.random.normal(ks[2], (hd, hd), jnp.float32)
    wv = 0.30 * jax.random.normal(ks[3], (hd, hd), jnp.float32)
    wfk = 0.30 * jax.random.normal(ks[4], (hd, hd), jnp.float32)   # fusion weight for k1
    wfx = 0.30 * jax.random.normal(ks[5], (hd, hd), jnp.float32)   # fusion weight for x
    bf = 0.10 * jax.random.normal(ks[6], (1, hd), jnp.float32)
    wc = 0.15 * jax.random.normal(ks[7], (D, D), jnp.float32)      # Conv1d(k=1) weight
    bc = 0.10 * jax.random.normal(ks[8], (1, D), jnp.float32)      # Conv1d bias
    params = (wq, wk, wv, wfk, wfx, bf, wc, bc)

    ref = reference(x, params, H)

    # Strict-precision path: f32 MXU inputs, exact softmax divide.
    out_f32 = cascaded_cfa(x, params, H,
                           compute_dtype=jnp.float32, approx_softmax=False)
    out_f32 = jax.block_until_ready(out_f32)
    assert out_f32.shape == (B, T, D)
    err_f32 = float(jnp.max(jnp.abs(out_f32 - ref)))
    assert jnp.allclose(out_f32, ref, atol=2e-3, rtol=2e-3), err_f32

    # Fast path: bf16 MXU ingest with f32 accumulation + EUP approx reciprocal.
    # Tolerance reflects bf16 weight rounding compounded through the 4-stage cascade.
    out_bf16 = cascaded_cfa(x, params, H)
    out_bf16 = jax.block_until_ready(out_bf16)
    err_bf16 = float(jnp.max(jnp.abs(out_bf16 - ref)))
    assert jnp.allclose(out_bf16, ref, atol=1e-1, rtol=1e-1), err_bf16

    print("KERNEL_OK")
</pallas_src>

<mosaic_0001>
module attributes {stable_mosaic.version = 11 : i64} {
  func.func @_cascade_kernel(%arg0: i32, %arg1: memref<4x1x8x128xf32, #tpu.memory_space<vmem>>, %arg2: memref<128x512xf32, #tpu.memory_space<vmem>>, %arg3: memref<1x128xf32, #tpu.memory_space<vmem>>, %arg4: memref<4x128x512xf32, #tpu.memory_space<vmem>>, %arg5: memref<1x512xf32, #tpu.memory_space<vmem>>, %arg6: memref<1x8x512xf32, #tpu.memory_space<vmem>>) attributes {dimension_semantics = [#tpu.dimension_semantics<parallel>], iteration_bounds = array<i64: 2>, scalar_prefetch = 0 : i64, scratch_operands = 0 : i64, tpu.core_type = #tpu.core_type<tc>, window_params = [{transform_indices = @transform_0, window_bounds = array<i64: 4, 1, 8, 128>}, {pipeline_mode = #tpu.pipeline_mode<synchronous>, transform_indices = @transform_1, window_bounds = array<i64: 128, 512>}, {pipeline_mode = #tpu.pipeline_mode<synchronous>, transform_indices = @transform_2, window_bounds = array<i64: 1, 128>}, {pipeline_mode = #tpu.pipeline_mode<synchronous>, transform_indices = @transform_3, window_bounds = array<i64: 4, 128, 512>}, {pipeline_mode = #tpu.pipeline_mode<synchronous>, transform_indices = @transform_4, window_bounds = array<i64: 1, 512>}, {transform_indices = @transform_5, window_bounds = array<i64: 1, 8, 512>}]} {
    %c0 = arith.constant 0 : index
    %c0_0 = arith.constant 0 : index
    %0 = vector.load %arg2[%c0, %c0_0] : memref<128x512xf32, #tpu.memory_space<vmem>>, vector<128x512xf32>
    %c0_1 = arith.constant 0 : index
    %c0_2 = arith.constant 0 : index
    %1 = vector.load %arg3[%c0_1, %c0_2] : memref<1x128xf32, #tpu.memory_space<vmem>>, vector<1x128xf32>
    %c0_3 = arith.constant 0 : index
    %c0_4 = arith.constant 0 : index
    %2 = vector.load %arg5[%c0_3, %c0_4] : memref<1x512xf32, #tpu.memory_space<vmem>>, vector<1x512xf32>
    %3 = vector.shape_cast %2 : vector<1x512xf32> to vector<1x512xf32>
    %4 = vector.broadcast %3 : vector<1x512xf32> to vector<8x512xf32>
    %cst = arith.constant 0.000000e+00 : f32
    %5 = vector.broadcast %cst : f32 to vector<8x128xf32>
    %c0_i32 = arith.constant 0 : i32
    %6 = arith.index_cast %c0_i32 : i32 to index
    %c0_5 = arith.constant 0 : index
    %c0_6 = arith.constant 0 : index
    %c0_7 = arith.constant 0 : index
    %7 = vector.load %arg1[%6, %c0_5, %c0_6, %c0_7] : memref<4x1x8x128xf32, #tpu.memory_space<vmem>>, vector<1x1x8x128xf32>
    %8 = vector.shape_cast %7 : vector<1x1x8x128xf32> to vector<1x8x128xf32>
    %9 = vector.shape_cast %8 : vector<1x8x128xf32> to vector<8x128xf32>
    %10 = arith.addf %5, %9 : vector<8x128xf32>
    %cst_8 = arith.constant dense<0.000000e+00> : vector<8x512xf32>
    %11 = tpu.matmul %10, %0, %cst_8 {dimension_numbers = #tpu.dot_dimension_numbers<[1], [0], [0], [1], [0, 0, 1, 1], [], []>} : vector<8x128xf32>, vector<128x512xf32>, vector<8x512xf32> -> vector<8x512xf32>
    %12 = vector.extract_strided_slice %11 {offsets = [0, 0], sizes = [8, 128], strides = [1, 1]} : vector<8x512xf32> to vector<8x128xf32>
    %13 = vector.extract_strided_slice %11 {offsets = [0, 128], sizes = [8, 128], strides = [1, 1]} : vector<8x512xf32> to vector<8x128xf32>
    %14 = vector.extract_strided_slice %11 {offsets = [0, 256], sizes = [8, 128], strides = [1, 1]} : vector<8x512xf32> to vector<8x128xf32>
    %15 = vector.extract_strided_slice %11 {offsets = [0, 384], sizes = [8, 128], strides = [1, 1]} : vector<8x512xf32> to vector<8x128xf32>
    %16 = vector.broadcast %1 : vector<1x128xf32> to vector<8x128xf32>
    %17 = arith.addf %15, %16 : vector<8x128xf32>
    %18 = vector.shape_cast %12 : vector<8x128xf32> to vector<1x8x128xf32>
    %19 = vector.shape_cast %17 : vector<8x128xf32> to vector<1x8x128xf32>
    %20 = vector.shape_cast %14 : vector<8x128xf32> to vector<1x8x128xf32>
    "tpu.trace_start"() <{level = 10 : i32, message = "bqd,bkd->bqk"}> : () -> ()
    %cst_9 = arith.constant dense<0.000000e+00> : vector<1x8x8xf32>
    %21 = tpu.matmul %18, %19, %cst_9 {dimension_numbers = #tpu.dot_dimension_numbers<[2], [2], [1], [1], [0, 0, 0, 1, 1, 1], [0], [0]>} : vector<1x8x128xf32>, vector<1x8x128xf32>, vector<1x8x8xf32> -> vector<1x8x8xf32>
    "tpu.trace_stop"() : () -> ()
    %cst_10 = arith.constant dense<0xFF800000> : vector<1x8xf32>
    %22 = vector.multi_reduction <maximumf>, %21, %cst_10 [2] : vector<1x8x8xf32> to vector<1x8xf32>
    %23 = vector.shape_cast %22 : vector<1x8xf32> to vector<1x8x1xf32>
    %24 = vector.broadcast %23 : vector<1x8x1xf32> to vector<1x8x8xf32>
    %25 = arith.subf %21, %24 : vector<1x8x8xf32>
    %26 = math.exp %25 : vector<1x8x8xf32>
    %cst_11 = arith.constant dense<0.000000e+00> : vector<1x8xf32>
    %27 = vector.multi_reduction <add>, %26, %cst_11 [2] : vector<1x8x8xf32> to vector<1x8xf32>
    %28 = vector.shape_cast %27 : vector<1x8xf32> to vector<1x8x1xf32>
    "tpu.trace_start"() <{level = 10 : i32, message = "bqk,bkd->bqd"}> : () -> ()
    %cst_12 = arith.constant dense<0.000000e+00> : vector<1x8x128xf32>
    %29 = tpu.matmul %26, %20, %cst_12 {dimension_numbers = #tpu.dot_dimension_numbers<[2], [1], [1], [2], [0, 0, 0, 1, 1, 2], [0], [0]>} : vector<1x8x8xf32>, vector<1x8x128xf32>, vector<1x8x128xf32> -> vector<1x8x128xf32>
    "tpu.trace_stop"() : () -> ()
    %30 = vector.broadcast %28 : vector<1x8x1xf32> to vector<1x8x128xf32>
    %31 = arith.divf %29, %30 : vector<1x8x128xf32>
    %32 = vector.shape_cast %31 : vector<1x8x128xf32> to vector<8x128xf32>
    %33 = arith.addf %13, %32 : vector<8x128xf32>
    %cst_13 = arith.constant 0.000000e+00 : f32
    %34 = vector.broadcast %cst_13 : f32 to vector<8x128xf32>
    %35 = arith.maximumf %33, %34 : vector<8x128xf32>
    %36 = arith.index_cast %c0_i32 : i32 to index
    %c0_14 = arith.constant 0 : index
    %c0_15 = arith.constant 0 : index
    %37 = vector.load %arg4[%36, %c0_14, %c0_15] : memref<4x128x512xf32, #tpu.memory_space<vmem>>, vector<1x128x512xf32>
    %38 = vector.shape_cast %37 : vector<1x128x512xf32> to vector<128x512xf32>
    %cst_16 = arith.constant dense<0.000000e+00> : vector<8x512xf32>
    %39 = tpu.matmul %35, %38, %cst_16 {dimension_numbers = #tpu.dot_dimension_numbers<[1], [0], [0], [1], [0, 0, 1, 1], [], []>} : vector<8x128xf32>, vector<128x512xf32>, vector<8x512xf32> -> vector<8x512xf32>
    %40 = arith.addf %4, %39 : vector<8x512xf32>
    %c1_i32 = arith.constant 1 : i32
    %41 = arith.index_cast %c1_i32 : i32 to index
    %c0_17 = arith.constant 0 : index
    %c0_18 = arith.constant 0 : index
    %c0_19 = arith.constant 0 : index
    %42 = vector.load %arg1[%41, %c0_17, %c0_18, %c0_19] : memref<4x1x8x128xf32, #tpu.memory_space<vmem>>, vector<1x1x8x128xf32>
    %43 = vector.shape_cast %42 : vector<1x1x8x128xf32> to vector<1x8x128xf32>
    %44 = vector.shape_cast %43 : vector<1x8x128xf32> to vector<8x128xf32>
    %45 = arith.addf %33, %44 : vector<8x128xf32>
    %cst_20 = arith.constant dense<0.000000e+00> : vector<8x512xf32>
    %46 = tpu.matmul %45, %0, %cst_20 {dimension_numbers = #tpu.dot_dimension_numbers<[1], [0], [0], [1], [0, 0, 1, 1], [], []>} : vector<8x128xf32>, vector<128x512xf32>, vector<8x512xf32> -> vector<8x512xf32>
    %47 = vector.extract_strided_slice %46 {offsets = [0, 0], sizes = [8, 128], strides = [1, 1]} : vector<8x512xf32> to vector<8x128xf32>
    %48 = vector.extract_strided_slice %46 {offsets = [0, 128], sizes = [8, 128], strides = [1, 1]} : vector<8x512xf32> to vector<8x128xf32>
    %49 = vector.extract_strided_slice %46 {offsets = [0, 256], sizes = [8, 128], strides = [1, 1]} : vector<8x512xf32> to vector<8x128xf32>
    %50 = vector.extract_strided_slice %46 {offsets = [0, 384], sizes = [8, 128], strides = [1, 1]} : vector<8x512xf32> to vector<8x128xf32>
    %51 = vector.broadcast %1 : vector<1x128xf32> to vector<8x128xf32>
    %52 = arith.addf %50, %51 : vector<8x128xf32>
    %53 = vector.shape_cast %47 : vector<8x128xf32> to vector<1x8x128xf32>
    %54 = vector.shape_cast %52 : vector<8x128xf32> to vector<1x8x128xf32>
    %55 = vector.shape_cast %49 : vector<8x128xf32> to vector<1x8x128xf32>
    "tpu.trace_start"() <{level = 10 : i32, message = "bqd,bkd->bqk"}> : () -> ()
    %cst_21 = arith.constant dense<0.000000e+00> : vector<1x8x8xf32>
    %56 = tpu.matmul %53, %54, %cst_21 {dimension_numbers = #tpu.dot_dimension_numbers<[2], [2], [1], [1], [0, 0, 0, 1, 1, 1], [0], [0]>} : vector<1x8x128xf32>, vector<1x8x128xf32>, vector<1x8x8xf32> -> vector<1x8x8xf32>
    "tpu.trace_stop"() : () -> ()
    %cst_22 = arith.constant dense<0xFF800000> : vector<1x8xf32>
    %57 = vector.multi_reduction <maximumf>, %56, %cst_22 [2] : vector<1x8x8xf32> to vector<1x8xf32>
    %58 = vector.shape_cast %57 : vector<1x8xf32> to vector<1x8x1xf32>
    %59 = vector.broadcast %58 : vector<1x8x1xf32> to vector<1x8x8xf32>
    %60 = arith.subf %56, %59 : vector<1x8x8xf32>
    %61 = math.exp %60 : vector<1x8x8xf32>
    %cst_23 = arith.constant dense<0.000000e+00> : vector<1x8xf32>
    %62 = vector.multi_reduction <add>, %61, %cst_23 [2] : vector<1x8x8xf32> to vector<1x8xf32>
    %63 = vector.shape_cast %62 : vector<1x8xf32> to vector<1x8x1xf32>
    "tpu.trace_start"() <{level = 10 : i32, message = "bqk,bkd->bqd"}> : () -> ()
    %cst_24 = arith.constant dense<0.000000e+00> : vector<1x8x128xf32>
    %64 = tpu.matmul %61, %55, %cst_24 {dimension_numbers = #tpu.dot_dimension_numbers<[2], [1], [1], [2], [0, 0, 0, 1, 1, 2], [0], [0]>} : vector<1x8x8xf32>, vector<1x8x128xf32>, vector<1x8x128xf32> -> vector<1x8x128xf32>
    "tpu.trace_stop"() : () -> ()
    %65 = vector.broadcast %63 : vector<1x8x1xf32> to vector<1x8x128xf32>
    %66 = arith.divf %64, %65 : vector<1x8x128xf32>
    %67 = vector.shape_cast %66 : vector<1x8x128xf32> to vector<8x128xf32>
    %68 = arith.addf %48, %67 : vector<8x128xf32>
    %cst_25 = arith.constant 0.000000e+00 : f32
    %69 = vector.broadcast %cst_25 : f32 to vector<8x128xf32>
    %70 = arith.maximumf %68, %69 : vector<8x128xf32>
    %71 = arith.index_cast %c1_i32 : i32 to index
    %c0_26 = arith.constant 0 : index
    %c0_27 = arith.constant 0 : index
    %72 = vector.load %arg4[%71, %c0_26, %c0_27] : memref<4x128x512xf32, #tpu.memory_space<vmem>>, vector<1x128x512xf32>
    %73 = vector.shape_cast %72 : vector<1x128x512xf32> to vector<128x512xf32>
    %cst_28 = arith.constant dense<0.000000e+00> : vector<8x512xf32>
    %74 = tpu.matmul %70, %73, %cst_28 {dimension_numbers = #tpu.dot_dimension_numbers<[1], [0], [0], [1], [0, 0, 1, 1], [], []>} : vector<8x128xf32>, vector<128x512xf32>, vector<8x512xf32> -> vector<8x512xf32>
    %75 = arith.addf %40, %74 : vector<8x512xf32>
    %c2_i32 = arith.constant 2 : i32
    %76 = arith.index_cast %c2_i32 : i32 to index
    %c0_29 = arith.constant 0 : index
    %c0_30 = arith.constant 0 : index
    %c0_31 = arith.constant 0 : index
    %77 = vector.load %arg1[%76, %c0_29, %c0_30, %c0_31] : memref<4x1x8x128xf32, #tpu.memory_space<vmem>>, vector<1x1x8x128xf32>
    %78 = vector.shape_cast %77 : vector<1x1x8x128xf32> to vector<1x8x128xf32>
    %79 = vector.shape_cast %78 : vector<1x8x128xf32> to vector<8x128xf32>
    %80 = arith.addf %68, %79 : vector<8x128xf32>
    %cst_32 = arith.constant dense<0.000000e+00> : vector<8x512xf32>
    %81 = tpu.matmul %80, %0, %cst_32 {dimension_numbers = #tpu.dot_dimension_numbers<[1], [0], [0], [1], [0, 0, 1, 1], [], []>} : vector<8x128xf32>, vector<128x512xf32>, vector<8x512xf32> -> vector<8x512xf32>
    %82 = vector.extract_strided_slice %81 {offsets = [0, 0], sizes = [8, 128], strides = [1, 1]} : vector<8x512xf32> to vector<8x128xf32>
    %83 = vector.extract_strided_slice %81 {offsets = [0, 128], sizes = [8, 128], strides = [1, 1]} : vector<8x512xf32> to vector<8x128xf32>
    %84 = vector.extract_strided_slice %81 {offsets = [0, 256], sizes = [8, 128], strides = [1, 1]} : vector<8x512xf32> to vector<8x128xf32>
    %85 = vector.extract_strided_slice %81 {offsets = [0, 384], sizes = [8, 128], strides = [1, 1]} : vector<8x512xf32> to vector<8x128xf32>
    %86 = vector.broadcast %1 : vector<1x128xf32> to vector<8x128xf32>
    %87 = arith.addf %85, %86 : vector<8x128xf32>
    %88 = vector.shape_cast %82 : vector<8x128xf32> to vector<1x8x128xf32>
    %89 = vector.shape_cast %87 : vector<8x128xf32> to vector<1x8x128xf32>
    %90 = vector.shape_cast %84 : vector<8x128xf32> to vector<1x8x128xf32>
    "tpu.trace_start"() <{level = 10 : i32, message = "bqd,bkd->bqk"}> : () -> ()
    %cst_33 = arith.constant dense<0.000000e+00> : vector<1x8x8xf32>
    %91 = tpu.matmul %88, %89, %cst_33 {dimension_numbers = #tpu.dot_dimension_numbers<[2], [2], [1], [1], [0, 0, 0, 1, 1, 1], [0], [0]>} : vector<1x8x128xf32>, vector<1x8x128xf32>, vector<1x8x8xf32> -> vector<1x8x8xf32>
    "tpu.trace_stop"() : () -> ()
    %cst_34 = arith.constant dense<0xFF800000> : vector<1x8xf32>
    %92 = vector.multi_reduction <maximumf>, %91, %cst_34 [2] : vector<1x8x8xf32> to vector<1x8xf32>
    %93 = vector.shape_cast %92 : vector<1x8xf32> to vector<1x8x1xf32>
    %94 = vector.broadcast %93 : vector<1x8x1xf32> to vector<1x8x8xf32>
    %95 = arith.subf %91, %94 : vector<1x8x8xf32>
    %96 = math.exp %95 : vector<1x8x8xf32>
    %cst_35 = arith.constant dense<0.000000e+00> : vector<1x8xf32>
    %97 = vector.multi_reduction <add>, %96, %cst_35 [2] : vector<1x8x8xf32> to vector<1x8xf32>
    %98 = vector.shape_cast %97 : vector<1x8xf32> to vector<1x8x1xf32>
    "tpu.trace_start"() <{level = 10 : i32, message = "bqk,bkd->bqd"}> : () -> ()
    %cst_36 = arith.constant dense<0.000000e+00> : vector<1x8x128xf32>
    %99 = tpu.matmul %96, %90, %cst_36 {dimension_numbers = #tpu.dot_dimension_numbers<[2], [1], [1], [2], [0, 0, 0, 1, 1, 2], [0], [0]>} : vector<1x8x8xf32>, vector<1x8x128xf32>, vector<1x8x128xf32> -> vector<1x8x128xf32>
    "tpu.trace_stop"() : () -> ()
    %100 = vector.broadcast %98 : vector<1x8x1xf32> to vector<1x8x128xf32>
    %101 = arith.divf %99, %100 : vector<1x8x128xf32>
    %102 = vector.shape_cast %101 : vector<1x8x128xf32> to vector<8x128xf32>
    %103 = arith.addf %83, %102 : vector<8x128xf32>
    %cst_37 = arith.constant 0.000000e+00 : f32
    %104 = vector.broadcast %cst_37 : f32 to vector<8x128xf32>
    %105 = arith.maximumf %103, %104 : vector<8x128xf32>
    %106 = arith.index_cast %c2_i32 : i32 to index
    %c0_38 = arith.constant 0 : index
    %c0_39 = arith.constant 0 : index
    %107 = vector.load %arg4[%106, %c0_38, %c0_39] : memref<4x128x512xf32, #tpu.memory_space<vmem>>, vector<1x128x512xf32>
    %108 = vector.shape_cast %107 : vector<1x128x512xf32> to vector<128x512xf32>
    %cst_40 = arith.constant dense<0.000000e+00> : vector<8x512xf32>
    %109 = tpu.matmul %105, %108, %cst_40 {dimension_numbers = #tpu.dot_dimension_numbers<[1], [0], [0], [1], [0, 0, 1, 1], [], []>} : vector<8x128xf32>, vector<128x512xf32>, vector<8x512xf32> -> vector<8x512xf32>
    %110 = arith.addf %75, %109 : vector<8x512xf32>
    %c3_i32 = arith.constant 3 : i32
    %111 = arith.index_cast %c3_i32 : i32 to index
    %c0_41 = arith.constant 0 : index
    %c0_42 = arith.constant 0 : index
    %c0_43 = arith.constant 0 : index
    %112 = vector.load %arg1[%111, %c0_41, %c0_42, %c0_43] : memref<4x1x8x128xf32, #tpu.memory_space<vmem>>, vector<1x1x8x128xf32>
    %113 = vector.shape_cast %112 : vector<1x1x8x128xf32> to vector<1x8x128xf32>
    %114 = vector.shape_cast %113 : vector<1x8x128xf32> to vector<8x128xf32>
    %115 = arith.addf %103, %114 : vector<8x128xf32>
    %cst_44 = arith.constant dense<0.000000e+00> : vector<8x512xf32>
    %116 = tpu.matmul %115, %0, %cst_44 {dimension_numbers = #tpu.dot_dimension_numbers<[1], [0], [0], [1], [0, 0, 1, 1], [], []>} : vector<8x128xf32>, vector<128x512xf32>, vector<8x512xf32> -> vector<8x512xf32>
    %117 = vector.extract_strided_slice %116 {offsets = [0, 0], sizes = [8, 128], strides = [1, 1]} : vector<8x512xf32> to vector<8x128xf32>
    %118 = vector.extract_strided_slice %116 {offsets = [0, 128], sizes = [8, 128], strides = [1, 1]} : vector<8x512xf32> to vector<8x128xf32>
    %119 = vector.extract_strided_slice %116 {offsets = [0, 256], sizes = [8, 128], strides = [1, 1]} : vector<8x512xf32> to vector<8x128xf32>
    %120 = vector.extract_strided_slice %116 {offsets = [0, 384], sizes = [8, 128], strides = [1, 1]} : vector<8x512xf32> to vector<8x128xf32>
    %121 = vector.broadcast %1 : vector<1x128xf32> to vector<8x128xf32>
    %122 = arith.addf %120, %121 : vector<8x128xf32>
    %123 = vector.shape_cast %117 : vector<8x128xf32> to vector<1x8x128xf32>
    %124 = vector.shape_cast %122 : vector<8x128xf32> to vector<1x8x128xf32>
    %125 = vector.shape_cast %119 : vector<8x128xf32> to vector<1x8x128xf32>
    "tpu.trace_start"() <{level = 10 : i32, message = "bqd,bkd->bqk"}> : () -> ()
    %cst_45 = arith.constant dense<0.000000e+00> : vector<1x8x8xf32>
    %126 = tpu.matmul %123, %124, %cst_45 {dimension_numbers = #tpu.dot_dimension_numbers<[2], [2], [1], [1], [0, 0, 0, 1, 1, 1], [0], [0]>} : vector<1x8x128xf32>, vector<1x8x128xf32>, vector<1x8x8xf32> -> vector<1x8x8xf32>
    "tpu.trace_stop"() : () -> ()
    %cst_46 = arith.constant dense<0xFF800000> : vector<1x8xf32>
    %127 = vector.multi_reduction <maximumf>, %126, %cst_46 [2] : vector<1x8x8xf32> to vector<1x8xf32>
    %128 = vector.shape_cast %127 : vector<1x8xf32> to vector<1x8x1xf32>
    %129 = vector.broadcast %128 : vector<1x8x1xf32> to vector<1x8x8xf32>
    %130 = arith.subf %126, %129 : vector<1x8x8xf32>
    %131 = math.exp %130 : vector<1x8x8xf32>
    %cst_47 = arith.constant dense<0.000000e+00> : vector<1x8xf32>
    %132 = vector.multi_reduction <add>, %131, %cst_47 [2] : vector<1x8x8xf32> to vector<1x8xf32>
    %133 = vector.shape_cast %132 : vector<1x8xf32> to vector<1x8x1xf32>
    "tpu.trace_start"() <{level = 10 : i32, message = "bqk,bkd->bqd"}> : () -> ()
    %cst_48 = arith.constant dense<0.000000e+00> : vector<1x8x128xf32>
    %134 = tpu.matmul %131, %125, %cst_48 {dimension_numbers = #tpu.dot_dimension_numbers<[2], [1], [1], [2], [0, 0, 0, 1, 1, 2], [0], [0]>} : vector<1x8x8xf32>, vector<1x8x128xf32>, vector<1x8x128xf32> -> vector<1x8x128xf32>
    "tpu.trace_stop"() : () -> ()
    %135 = vector.broadcast %133 : vector<1x8x1xf32> to vector<1x8x128xf32>
    %136 = arith.divf %134, %135 : vector<1x8x128xf32>
    %137 = vector.shape_cast %136 : vector<1x8x128xf32> to vector<8x128xf32>
    %138 = arith.addf %118, %137 : vector<8x128xf32>
    %cst_49 = arith.constant 0.000000e+00 : f32
    %139 = vector.broadcast %cst_49 : f32 to vector<8x128xf32>
    %140 = arith.maximumf %138, %139 : vector<8x128xf32>
    %141 = arith.index_cast %c3_i32 : i32 to index
    %c0_50 = arith.constant 0 : index
    %c0_51 = arith.constant 0 : index
    %142 = vector.load %arg4[%141, %c0_50, %c0_51] : memref<4x128x512xf32, #tpu.memory_space<vmem>>, vector<1x128x512xf32>
    %143 = vector.shape_cast %142 : vector<1x128x512xf32> to vector<128x512xf32>
    %cst_52 = arith.constant dense<0.000000e+00> : vector<8x512xf32>
    %144 = tpu.matmul %140, %143, %cst_52 {dimension_numbers = #tpu.dot_dimension_numbers<[1], [0], [0], [1], [0, 0, 1, 1], [], []>} : vector<8x128xf32>, vector<128x512xf32>, vector<8x512xf32> -> vector<8x512xf32>
    %145 = arith.addf %110, %144 : vector<8x512xf32>
    %c4_i32 = arith.constant 4 : i32
    %146 = vector.shape_cast %145 : vector<8x512xf32> to vector<1x8x512xf32>
    %c0_53 = arith.constant 0 : index
    %c0_54 = arith.constant 0 : index
    %c0_55 = arith.constant 0 : index
    %147 = vector.load %arg6[%c0_53, %c0_54, %c0_55] : memref<1x8x512xf32, #tpu.memory_space<vmem>>, vector<1x8x512xf32>
    tpu.vector_store %arg6[%c0_53, %c0_54, %c0_55], %146 {strides = array<i32>} : memref<1x8x512xf32, #tpu.memory_space<vmem>>, vector<1x8x512xf32>,
    return
  }
  func.func @transform_0(%arg0: i32) -> (i32, i32, i32, i32) {
    %c0_i32 = arith.constant 0 : i32
    %c0_i32_0 = arith.constant 0 : i32
    %c0_i32_1 = arith.constant 0 : i32
    %c0_i32_2 = arith.constant 0 : i32
    return %c0_i32, %arg0, %c0_i32_0, %c0_i32_1 : i32, i32, i32, i32
  }
  func.func @transform_1(%arg0: i32) -> (i32, i32) {
    %c0_i32 = arith.constant 0 : i32
    %c0_i32_0 = arith.constant 0 : i32
    %c0_i32_1 = arith.constant 0 : i32
    return %c0_i32, %c0_i32_0 : i32, i32
  }
  func.func @transform_2(%arg0: i32) -> (i32, i32) {
    %c0_i32 = arith.constant 0 : i32
    %c0_i32_0 = arith.constant 0 : i32
    %c0_i32_1 = arith.constant 0 : i32
    return %c0_i32, %c0_i32_0 : i32, i32
  }
  func.func @transform_3(%arg0: i32) -> (i32, i32, i32) {
    %c0_i32 = arith.constant 0 : i32
    %c0_i32_0 = arith.constant 0 : i32
    %c0_i32_1 = arith.constant 0 : i32
    %c0_i32_2 = arith.constant 0 : i32
    return %c0_i32, %c0_i32_0, %c0_i32_1 : i32, i32, i32
  }
  func.func @transform_4(%arg0: i32) -> (i32, i32) {
    %c0_i32 = arith.constant 0 : i32
    %c0_i32_0 = arith.constant 0 : i32
    %c0_i32_1 = arith.constant 0 : i32
    return %c0_i32, %c0_i32_0 : i32, i32
  }
  func.func @transform_5(%arg0: i32) -> (i32, i32, i32) {
    %c0_i32 = arith.constant 0 : i32
    %c0_i32_0 = arith.constant 0 : i32
    %c0_i32_1 = arith.constant 0 : i32
    return %arg0, %c0_i32, %c0_i32_0 : i32, i32, i32
  }
}

</mosaic_0001>

<bundles_post_ra>
// kernel: tpu_custom_call.1
= control target key start
LH: loop header
LB: loop body
LE: loop exit
PB: predicated region body
PF: predicated region fallthrough
CT: control target
= control target key end

     0   :  { %10 = vsyncpa [#allocation3], 0  ;;  %s3683_s0 = inlined_call_operand.hbm [shape: f32[4,2,8,128], index: 0, kind: input, shape index: {}]   ;;  %s3684_s1 = inlined_call_operand.hbm [shape: f32[128,512], index: 1, kind: input, shape index: {}]   ;;  %s3685_s2 = inlined_call_operand.vmem [shape: f32[1,128], index: 2, kind: input, shape index: {}]   ;;  %s3686_s3 = inlined_call_operand.hbm [shape: f32[4,128,512], index: 3, kind: input, shape index: {}]   ;;  %s3687_s4 = inlined_call_operand.vmem [shape: f32[1,512], index: 4, kind: input, shape index: {}]   ;;  %s3688_s5 = inlined_call_operand.hbm [shape: f32[2,8,512], index: 5, kind: output, shape index: {}]  }
   0x1   :  { %12 = vsyncpa [#allocation3 + $0x1], 0 }
   0x2   :  { %13 = vsyncpa [#allocation6], 0 }
   0x3   :  { %14 = vsyncpa [#allocation4], 0 }
   0x4   :  { %16 = vsyncpa [#allocation4 + $0x1], 0  ;;  %s2951_s18 = smov 0   ;;  %s2953_s19 = smov 0  }
   0x5   :  { %s2955_s20 = smov 0   ;;  %s2957_s21 = smov 0  }
   0x6 LB: > { %s2972_s22 = sadd.s32 4294967295, %s2908_s21   ;;  %s2523_s23 = sadd.s32 4294967294, %s2908_s21   ;;  %s2908_s21 = sphi %s2957_s21, %s3808_s21   ;;  %s2904_s20 = sphi %s2955_s20, %s3807_s20   ;;  %s2900_s19 = sphi %s2953_s19, %s3806_s19   ;;  %s2896_s18 = sphi %s2951_s18, %s3805_s18  }
   0x7   : > { %s2976_s24 = sadd.s32 1, %s2908_s21   ;;  %s29_s25 = sadd.s32 1, %s2904_s20 }
   0x8   : > { %s26_s26 = ssub.s32 %s2908_s21, %s2976_s24  ;;  %p36_p0 = scmp.ne.s32.totalorder %s2904_s20, %s2900_s19 }
   0x9   : > { %p27_p1 = scmp.eq.s32.totalorder %s26_s26, 0  ;;  %p37_p2 = scmp.eq.s32.totalorder %s2908_s21, 0 }
   0xa   : > { %p42_p3 = scmp.ne.s32.totalorder %s2900_s19, %s2896_s18  ;;  %p3690_p4 = scmp.eq.s32.totalorder %s2972_s22, 0 }
   0xb   : > { %s2988_s27 = scalar_select %p27_p1, %s2904_s20, %s29_s25  }
   0xc   : > { %p2990_p5 = por %p37_p2, %p36_p0  ;;  %p2996_p6 = por %p3690_p4, %p42_p3 }
   0xd   : > { %p150_p7 = scmp.eq.s32.totalorder %s2972_s22, 1  ;;  %p156_p8 = scmp.eq.s32.totalorder %s2523_s23, 1 }
   0xe   : > { %s3740_s29 = scalar_select %p2996_p6, 1, 0 }
   0xf   : > { %p2524_p9 = scmp.ge.s32.totalorder %s2908_s21, 1  ;;  %p163_p10 = scmp.lt.s32.totalorder %s2908_s21, 3 }
  0x10   : > { %p3003_p11 = por %p150_p7, %p36_p0  ;;  %p3007_p12 = por %p156_p8, %p42_p3 }
  0x11   : > { %p3011_p13 = pnand %p2524_p9, %p163_p10  ;;  %s2910_s8 = smov [#allocation5]  }
  0x12   : > { %s3741_s30 = scalar_select %p3003_p11, 1, 0 }
  0x13   : > { %s3742_s6 = scalar_select %p3007_p12, 1, 0 }
  0x14   : > { %s3743_s7 = scalar_select %p3011_p13, 1, 0 }
  0x15   : > { %p2617_p1 = pneg %p3011_p13  ;;  %s175_s9 = sshll.u32 %s2910_s8, 4  ;;  %s176_s9 = int_to_ptr.vmem [resolvable:$true] %s175_s9 }
  0x16   : > { %p2634_p3 = scmp.lt.s32.totalorder %s2908_s21, 2  ;;  %s2911_s11 = smov [#allocation7]  }
  0x17   : > { %p3019_p2 = pnand %p2617_p1, %p3690_p4  ;;  %s191_s12 = sshll.u32 %s2911_s11, 4  ;;  %s192_s12 = int_to_ptr.vmem [resolvable:$true] %s191_s12 }
  0x18   : > { %s2771_s13 = scalar_lea.vmem %s176_s9, 8192  ;;  %p2779_p12 = scmp.lt.s32.totalorder %s176_s9, %s176_s9 }
  0x19   : > { %p2762_p7 = pneg %p3019_p2  ;;  %p2772_p8 = scmp.ne.s32.totalorder %s176_s9, %s2771_s13 }
  0x1a   : > { %p2780_p11 = scmp.lt.s32.totalorder %s2771_s13, %s2771_s13 }
  0x1b   : > { %p2774_p9 = pnand %p2772_p8, %p2762_p7 }
  0x1c   : > { %p2781_p1 = por %p2780_p11, %p2779_p12 }
  0x1d   : > { %p2775_p10 = pneg %p2774_p9 }
  0x1f   : > { %p2782_p4 = pnand %p2781_p1, %p2775_p10 }
  0x21   : > { %2785 = shalt.err (!%p2782_p4)
}
  0x22   : > { %s2912_s14 = smov 512   ;;  %s2913_s15 = smov 32  }
  0x23   : > { %2620 = dma.hbm_to_vmem [thread:$0]  (!%p3019_p2), %s3684_s1, 8192, %s176_s9, [#allocation6], %s2912_s14, %s2912_s14, %s2913_s15  }
  0x24   : > { %p3039_p8 = pnand %p2634_p3, %p2990_p5  ;;  %s2797_s25 = scalar_lea.vmem %s192_s12, 32768 }
  0x25   : > { %p2798_p4 = scmp.ne.s32.totalorder %s192_s12, %s2797_s25  ;;  %p2805_p9 = scmp.lt.s32.totalorder %s192_s12, %s192_s12 }
  0x26   : > { %p2806_p10 = scmp.lt.s32.totalorder %s2797_s25, %s2797_s25 }
  0x27   : > { %p2800_p11 = pnand %p2798_p4, %p2762_p7 }
  0x28   : > { %p2807_p1 = por %p2806_p10, %p2805_p9 }
  0x29   : > { %p2801_p12 = pneg %p2800_p11 }
  0x2b   : > { %p2808_p0 = pnand %p2807_p1, %p2801_p12 }
  0x2d   : > { %2811 = shalt.err (!%p2808_p0)
}
  0x2e   : > { %2623 = dma.hbm_to_vmem [thread:$0]  (!%p3019_p2), %s3686_s3, 32768, %s192_s12, [#allocation6], %s2912_s14, %s2912_s14, %s2913_s15  }
  0x2f   : > { %s208_s8 = sand.u32 1, %s2904_s20   ;;  %s2529_s11 = sshll.u32 %s2908_s21, 7 }
  0x30   : > { %s2528_s9 = sshll.u32 %s208_s8, 5  ;;  %s3056_s17 = scalar_lea.hbm %s3683_s0, %s2529_s11 }
  0x31   : > { %s212_s25 = scalar_lea.vmem [#allocation2], %s2528_s9  ;;  %s3060_s26 = scalar_lea.sflag [#allocation3], %s208_s8 }
  0x32   : > { %s218_s10 = sshll.u32 %s212_s25, 4  ;;  %s2812_s28 = scalar_lea.hbm %s3056_s17, 512  ;;  %s3058_s10 = int_to_ptr.vmem [resolvable:$true] %s218_s10 }
  0x33   : > { %p2813_p5 = scmp.ne.s32.totalorder %s3056_s17, %s2812_s28  ;;  %p2814_p2 = pneg %p3039_p8 }
  0x34   : > { %s2817_s15 = scalar_lea.hbm %s3683_s0, 1024  ;;  %p2818_p7 = scmp.lt.s32.totalorder %s3056_s17, %s3683_s0 }
  0x35   : > { %p2815_p0 = pnand %p2814_p2, %p2813_p5  ;;  %p2819_p4 = scmp.lt.s32.totalorder %s2817_s15, %s2812_s28 }
  0x37   : > { %p2816_p3 = pneg %p2815_p0  ;;  %p2820_p11 = por %p2819_p4, %p2818_p7 }
  0x39   : > { %p2821_p12 = pnand %p2820_p11, %p2816_p3 }
  0x3b   : > { %2824 = shalt.err (!%p2821_p12)
}
  0x3c   : > { %s2825_s8 = scalar_lea.vmem %s3058_s10, 512  ;;  %s2914_s9 = smov [#allocation2]  }
  0x3d   : > { %p2826_p9 = scmp.ne.s32.totalorder %s3058_s10, %s2825_s8  ;;  %s2830_s16 = sshll.u32 %s2914_s9, 4  ;;  %s2831_s16 = int_to_ptr.vmem [resolvable:$false] %s2830_s16 }
  0x3e   : > { %s2832_s25 = scalar_lea.vmem %s2831_s16, 1024  ;;  %p2833_p5 = scmp.lt.s32.totalorder %s3058_s10, %s2831_s16 }
  0x3f   : > { %p2828_p10 = pnand %p2826_p9, %p2814_p2  ;;  %p2834_p0 = scmp.lt.s32.totalorder %s2832_s25, %s2825_s8 }
  0x41   : > { %p2829_p1 = pneg %p2828_p10  ;;  %p2835_p6 = por %p2834_p0, %p2833_p5 }
  0x43   : > { %p2836_p13 = pnand %p2835_p6, %p2829_p1 }
  0x45   : > { %2839 = shalt.err (!%p2836_p13)
}
  0x46   : > { %s2915_s28 = smov 256   ;;  %s2916_s12 = smov 128  }
  0x47   : > { %s2917_s14 = smov 8   ;;  %p3746_p2 = scmp.ne.s32.totalorder %s3743_s7, 0 }
  0x48   : > { %2627 = dma.hbm_to_vmem [thread:$0]  (!%p3039_p8), %s3056_s17, 512, %s3058_s10, %s3060_s26, %s2915_s28, %s2916_s12, %s2917_s14  }
  0x49   : > { %230 = sbr.rel (%p3746_p2) target bundleno = 3424 (0xd60), region = 40 }
  0x4e   : > { %s3084_s15 = sand.u32 1, %s2900_s19   ;;  %p3747_p6 = scmp.ne.s32.totalorder %s3740_s29, 0 }
  0x4f   : > { %s2531_s11 = sshll.u32 %s3084_s15, 5  ;;  %s233_s13 = scalar_lea.sflag [#allocation3], %s3084_s15 }
  0x50   : > { %s3090_s8 = scalar_lea.vmem [#allocation2], %s2531_s11 }
  0x51   : > { %2883 = dma.done.wait (%p3747_p6), %s233_s13, 512  }
  0x52   : > { %2885 = vsyncadd (%p3747_p6), %s233_s13, 4294966784  ;;  %p3748_p13 = scmp.eq.s32.totalorder %s2972_s22, 0 }
  0x54   : > { %2887 = dma.done.wait (%p3748_p13), [#allocation6], 40960   ;;  %p3749_p8 = pmov %p3748_p13 }
  0x55   : > { %v3693_v0 = vmov 0.0   ;;  %v3102_v1 = vld [vmem:[#allocation5 + $0x1f8] sm:$0xff]  ;;  %v3104_v2 = vld [vmem:[#allocation5 + $0x1f0] sm:$0xff]  ;;  %v3111_v5 = vld [vmem:[#allocation5 + $0x1e8] sm:$0xff]  ;;  %vm2919_vm0 = vmmov 0   ;;  %vm579_vm1 = vcmask 64512  }
  0x56   : > { %2889 = vsyncadd (%p3749_p8), [#allocation6], 4294926336  ;;  %495 = vmatprep.mubr.f32.mxu1 %v3693_v0  ;;  %424 = vmatprep.mubr.f32.mxu0 %v3693_v0  ;;  %v3106_v3 = vld [vmem:[#allocation5 + $0x1d8] sm:$0xff]  ;;  %v3109_v4 = vld [vmem:[#allocation5 + $0x1d0] sm:$0xff]  ;;  %s2548_s9 = sshll.u32 %s2972_s22, 9  ;;  %s270_s16 = scalar_lea.vmem [#allocation8], %s2531_s11 }
  0x57   : > { %431 = vmatprep.subr.mxu1 %v3102_v1  ;;  %v3114_v6 = vld [vmem:[#allocation5 + $0x1b8] sm:$0xff]  ;;  %360 = vmatprep.subr.mxu0 %v3111_v5  ;;  %v3117_v7 = vld [vmem:[#allocation5 + $0x1e0] sm:$0xff]  ;;  %v3120_v8 = vld [vmem:[#allocation5 + $0x1b0] sm:$0xff]  ;;  %s2434_s25 = sshll.u32 %s270_s16, 4  ;;  %s3646_s22 = scalar_lea.hbm %s3688_s5, %s2548_s9  ;;  %s2435_s25 = int_to_ptr.vmem [resolvable:$true] %s2434_s25 }
  0x58   : > { %432 = vmatpush1.msra.mxu1 %v3104_v2  ;;  %361 = vmatpush1.msra.mxu0 %v3117_v7  ;;  %v3123_v9 = vld [vmem:[#allocation5 + $0x1c8] sm:$0xff]  ;;  %v3125_v10 = vld [vmem:[#allocation5 + $0x1c0] sm:$0xff]  ;;  %v3128_v11 = vld [vmem:[#allocation5 + $0x198] sm:$0xff]  ;;  %s2420_s14 = scalar_lea.sflag [#allocation4], %s3084_s15  ;;  %s2840_s11 = scalar_lea.vmem %s2435_s25, 512 }
  0x59   : > { %433 = vmatprep.subr.mxu1 %v3106_v3  ;;  %362 = vmatprep.subr.mxu0 %v3123_v9  ;;  %v3131_v12 = vld [vmem:[#allocation5 + $0x1a8] sm:$0xff]  ;;  %v3134_v13 = vld [vmem:[#allocation5 + $0x190] sm:$0xff]  ;;  %v3137_v14 = vld [vmem:[#allocation5 + $0x1a0] sm:$0xff]  ;;  %p2841_p3 = scmp.ne.s32.totalorder %s2435_s25, %s2840_s11  ;;  %p3802_p7 = scmp.ne.s32.totalorder %s3741_s30, 0 }
  0x5a   : > { %434 = vmatpush1.msra.mxu1 %v3109_v4  ;;  %363 = vmatpush1.msra.mxu0 %v3125_v10  ;;  %v3139_v15 = vld [vmem:[#allocation5 + $0x188] sm:$0xff]  ;;  %v3142_v16 = vld [vmem:[#allocation5 + $0x178] sm:$0xff]  ;;  %v3145_v17 = vld [vmem:[#allocation5 + $0x180] sm:$0xff]  ;;  %s2920_s13 = smov [#allocation8]  }
  0x5b   : > { %435 = vmatprep.subr.mxu1 %v3114_v6  ;;  %364 = vmatprep.subr.mxu0 %v3131_v12  ;;  %v3148_v18 = vld [vmem:[#allocation5 + $0x170] sm:$0xff]  ;;  %v3151_v19 = vld [vmem:[#allocation5 + $0x168] sm:$0xff]  ;;  %v3154_v20 = vld [vmem:[#allocation5 + $0x158] sm:$0xff]  ;;  %p2842_p4 = pnand %p2841_p3, %p3802_p7 }
  0x5c   : > { %436 = vmatpush1.msra.mxu1 %v3120_v8  ;;  %365 = vmatpush1.msra.mxu0 %v3137_v14  ;;  %v3157_v21 = vld [vmem:[#allocation5 + $0x160] sm:$0xff]  ;;  %v3160_v22 = vld [vmem:[#allocation5 + $0x150] sm:$0xff]  ;;  %v3163_v23 = vld [vmem:[#allocation5 + $0x148] sm:$0xff] }
  0x5d   : > { %437 = vmatprep.subr.mxu1 %v3128_v11  ;;  %366 = vmatprep.subr.mxu0 %v3139_v15  ;;  %v3166_v24 = vld [vmem:[#allocation5 + $0x138] sm:$0xff]  ;;  %v3169_v25 = vld [vmem:[#allocation5 + $0x140] sm:$0xff]  ;;  %v3172_v26 = vld [vmem:[#allocation5 + $0x130] sm:$0xff]  ;;  %p2843_p11 = pneg %p2842_p4 }
  0x5e   : > { %438 = vmatpush1.msra.mxu1 %v3134_v13  ;;  %367 = vmatpush1.msra.mxu0 %v3145_v17  ;;  %v3175_v27 = vld [vmem:[#allocation5 + $0x128] sm:$0xff]  ;;  %v3178_v28 = vld [vmem:[#allocation5 + $0x118] sm:$0xff]  ;;  %v3181_v29 = vld [vmem:[#allocation5 + $0x120] sm:$0xff] }
  0x5f   : > { %439 = vmatprep.subr.mxu1 %v3142_v16  ;;  %368 = vmatprep.subr.mxu0 %v3151_v19  ;;  %v3184_v30 = vld [vmem:[#allocation5 + $0x110] sm:$0xff]  ;;  %v3187_v31 = vld [vmem:[#allocation5 + $0x108] sm:$0xff]  ;;  %v3190_v32 = vld [vmem:[#allocation5 + $0xf8] sm:$0xff] }
  0x60   : > { %440 = vmatpush1.msra.mxu1 %v3148_v18  ;;  %369 = vmatpush1.msra.mxu0 %v3157_v21  ;;  %v3193_v33 = vld [vmem:[#allocation5 + $0x100] sm:$0xff]  ;;  %v3196_v34 = vld [vmem:[#allocation5 + $0xf0] sm:$0xff]  ;;  %v3199_v35 = vld [vmem:[#allocation5 + $0xe8] sm:$0xff] }
  0x61   : > { %441 = vmatprep.subr.mxu1 %v3154_v20  ;;  %370 = vmatprep.subr.mxu0 %v3163_v23  ;;  %v3202_v36 = vld [vmem:[#allocation5 + $0xd8] sm:$0xff]  ;;  %v3205_v37 = vld [vmem:[#allocation5 + $0xe0] sm:$0xff]  ;;  %v3208_v38 = vld [vmem:[#allocation5 + $0xd0] sm:$0xff] }
  0x62   : > { %442 = vmatpush1.msra.mxu1 %v3160_v22  ;;  %371 = vmatpush1.msra.mxu0 %v3169_v25  ;;  %v3211_v39 = vld [vmem:[#allocation5 + $0xc8] sm:$0xff]  ;;  %v3214_v40 = vld [vmem:[#allocation5 + $0xb8] sm:$0xff]  ;;  %v3217_v41 = vld [vmem:[#allocation5 + $0xc0] sm:$0xff] }
  0x63   : > { %443 = vmatprep.subr.mxu1 %v3166_v24  ;;  %372 = vmatprep.subr.mxu0 %v3175_v27  ;;  %v3220_v42 = vld [vmem:[#allocation5 + $0xb0] sm:$0xff]  ;;  %v3223_v43 = vld [vmem:[#allocation5 + $0xa8] sm:$0xff]  ;;  %v3226_v44 = vld [vmem:[#allocation5 + $0x98] sm:$0xff] }
  0x64   : > { %444 = vmatpush1.msra.mxu1 %v3172_v26  ;;  %373 = vmatpush1.msra.mxu0 %v3181_v29  ;;  %v3229_v45 = vld [vmem:[#allocation5 + $0xa0] sm:$0xff]  ;;  %v3232_v46 = vld [vmem:[#allocation5 + $0x90] sm:$0xff]  ;;  %v3235_v47 = vld [vmem:[#allocation5 + $0x88] sm:$0xff] }
  0x65   : > { %445 = vmatprep.subr.mxu1 %v3178_v28  ;;  %374 = vmatprep.subr.mxu0 %v3187_v31  ;;  %3750 = vst [vmem:[#allocation12_spill] sm:$0xff] %v3232_v46  ;;  %v3238_v48 = vld [vmem:[#allocation5 + $0x78] sm:$0xff]  ;;  %v3241_v49 = vld [vmem:[#allocation5 + $0x80] sm:$0xff]  ;;  %v3244_v50 = vld [vmem:[#allocation5 + $0x70] sm:$0xff] }
  0x66   : > { %446 = vmatpush1.msra.mxu1 %v3184_v30  ;;  %375 = vmatpush1.msra.mxu0 %v3193_v33  ;;  %3751 = vst [vmem:[#allocation13_spill] sm:$0xff] %v3238_v48  ;;  %3752 = vst [vmem:[#allocation14_spill] sm:$0xff] %v3244_v50  ;;  %v3247_v51 = vld [vmem:[#allocation5 + $0x68] sm:$0xff]  ;;  %v3250_v52 = vld [vmem:[#allocation5 + $0x58] sm:$0xff] }
  0x67   : > { %447 = vmatprep.subr.mxu1 %v3190_v32  ;;  %376 = vmatprep.subr.mxu0 %v3199_v35  ;;  %3753 = vst [vmem:[#allocation15_spill] sm:$0xff] %v3247_v51  ;;  %3754 = vst [vmem:[#allocation16_spill] sm:$0xff] %v3250_v52  ;;  %v3253_v53 = vld [vmem:[#allocation5 + $0x60] sm:$0xff]  ;;  %v3256_v54 = vld [vmem:[#allocation5 + $0x50] sm:$0xff] }
  0x68   : > { %448 = vmatpush1.msra.mxu1 %v3196_v34  ;;  %377 = vmatpush1.msra.mxu0 %v3205_v37  ;;  %3755 = vst [vmem:[#allocation17_spill] sm:$0xff] %v3253_v53  ;;  %3756 = vst [vmem:[#allocation18_spill] sm:$0xff] %v3256_v54  ;;  %v3259_v55 = vld [vmem:[#allocation5 + $0x48] sm:$0xff]  ;;  %v3262_v56 = vld [vmem:[#allocation5 + $0x38] sm:$0xff] }
  0x69   : > { %449 = vmatprep.subr.mxu1 %v3202_v36  ;;  %378 = vmatprep.subr.mxu0 %v3211_v39  ;;  %3757 = vst [vmem:[#allocation19_spill] sm:$0xff] %v3259_v55  ;;  %3758 = vst [vmem:[#allocation20_spill] sm:$0xff] %v3262_v56  ;;  %v3265_v57 = vld [vmem:[#allocation5 + $0x40] sm:$0xff]  ;;  %v3268_v58 = vld [vmem:[#allocation5 + $0x30] sm:$0xff] }
  0x6a   : > { %450 = vmatpush1.msra.mxu1 %v3208_v38  ;;  %379 = vmatpush1.msra.mxu0 %v3217_v41  ;;  %3759 = vst [vmem:[#allocation21_spill] sm:$0xff] %v3265_v57  ;;  %3760 = vst [vmem:[#allocation22_spill] sm:$0xff] %v3268_v58  ;;  %v3271_v59 = vld [vmem:[#allocation5 + $0x28] sm:$0xff]  ;;  %v3274_v60 = vld [vmem:[#allocation5 + $0x18] sm:$0xff] }
  0x6b   : > { %451 = vmatprep.subr.mxu1 %v3214_v40  ;;  %380 = vmatprep.subr.mxu0 %v3223_v43  ;;  %3761 = vst [vmem:[#allocation23_spill] sm:$0xff] %v3271_v59  ;;  %3762 = vst [vmem:[#allocation24_spill] sm:$0xff] %v3274_v60  ;;  %v3277_v61 = vld [vmem:[#allocation5 + $0x20] sm:$0xff]  ;;  %v3280_v62 = vld [vmem:[#allocation5 + $0x10] sm:$0xff] }
  0x6c   : > { %452 = vmatpush1.msra.mxu1 %v3220_v42  ;;  %381 = vmatpush1.msra.mxu0 %v3229_v45  ;;  %3763 = vst [vmem:[#allocation25_spill] sm:$0xff] %v3277_v61  ;;  %3764 = vst [vmem:[#allocation26_spill] sm:$0xff] %v3280_v62  ;;  %v3283_v63 = vld [vmem:[#allocation5 + $0x8] sm:$0xff]  ;;  %v358_v0 = vld [vmem:[%s3090_s8] sm:$0xff] }
  0x6d   : > { %453 = vmatprep.subr.mxu1 %v3226_v44  ;;  %382 = vmatprep.subr.mxu0 %v3235_v47  ;;  %3765 = vst [vmem:[#allocation27_spill] sm:$0xff] %v3283_v63 }
  0x6e   : > { %454 = vmatpush1.msra.mxu1 %v3232_v46  ;;  %383 = vmatpush1.msra.mxu0 %v3241_v49  ;;  %v709_v46 = vld [vmem:[#allocation7 + $0x158] sm:$0xff] }
  0x6f   : > { %455 = vmatprep.subr.mxu1 %v3238_v48  ;;  %384 = vmatprep.subr.mxu0 %v3247_v51  ;;  %v717_v48 = vld [vmem:[#allocation7 + $0x198] sm:$0xff]  ;;  %v710_v51 = vld [vmem:[#allocation7 + $0x160] sm:$0xff] }
  0x70   : > { %456 = vmatpush1.msra.mxu1 %v3244_v50  ;;  %385 = vmatpush1.msra.mxu0 %v3253_v53  ;;  %v728_v53 = vld [vmem:[#allocation7 + $0x1f0] sm:$0xff] }
  0x71   : > { %457 = vmatprep.subr.mxu1 %v3250_v52  ;;  %386 = vmatprep.subr.mxu0 %v3259_v55 }
  0x72   : > { %458 = vmatpush1.msra.mxu1 %v3256_v54  ;;  %387 = vmatpush1.msra.mxu0 %v3265_v57  ;;  %v3288_v54 = vld [vmem:[#allocation5] sm:$0xff] }
  0x73   : > { %459 = vmatprep.subr.mxu1 %v3262_v56  ;;  %388 = vmatprep.subr.mxu0 %v3271_v59  ;;  %3766 = vst [vmem:[#allocation28_spill] sm:$0xff] %v3288_v54  ;;  %v3767_v56 = vmov 0.0  }
  0x74   : > { %460 = vmatpush1.msra.mxu1 %v3268_v58  ;;  %389 = vmatpush1.msra.mxu0 %v3277_v61 }
  0x75   : > { %461 = vmatprep.subr.mxu1 %v3274_v60  ;;  %390 = vmatprep.subr.mxu0 %v3283_v63 }
  0x76   : > { %462 = vmatpush1.msra.mxu1 %v3280_v62  ;;  %391 = vmatpush1.msra.mxu0 %v3288_v54  ;;  %v3304_v62 = vld [vmem:[%s3685_s2] ss:$0 sm:$0xff] }
  0x77   : > { %496 = vmatmul.mubr.f32.vlgmr.msra.gmra.mxu1 %v358_v0  ;;  %425 = vmatmul.mubr.f32.vlgmr.msra.gmra.mxu0 %v358_v0  ;;  %3768 = vst [vmem:[#allocation29_spill] sm:$0xff] %v3304_v62 }
  0x78   : > { %2570 = vmatprep.subr.mxu1 %v3767_v56  ;;  %2565 = vmatprep.subr.mxu0 %v3767_v56 }
  0x79   : > { %2567 = vmatprep.mubr.msk.f32.mxu0 %vm2919_vm0, %v3767_v56  ;;  %2572 = vmatprep.mubr.msk.f32.mxu1 %vm2919_vm0, %v3767_v56 }
 0x137   : > { %v497_v60 = vpop.f32.mrf.mxu1  ;;  %v426_v63 = vpop.f32.mrf.mxu0 }
 0x138   : > { %2571 = vmatpush3.msra.mxu1 %v497_v60 }
 0x139   : > { %v499_v54 = vpop.f32.mrf.mxu1  ;;  %v3308_v58 = vpop.f32.mrf.mxu0 }
 0x13a   : > { %v508_v0 = vadd.f32 %v3304_v62, %v499_v54  ;;  %v726_v62 = vld [vmem:[#allocation7 + $0x1e0] sm:$0xff] }
 0x13c   : > { %2566 = vmatpush3.xpose.msra.mxu0 %v508_v0  ;;  %v729_v0 = vld [vmem:[#allocation7 + $0x1f8] sm:$0xff] }
 0x13d   : > { %801 = vmatprep.subr.mxu1 %v729_v0  ;;  %v716_v0 = vld [vmem:[#allocation7 + $0x190] sm:$0xff] }
 0x13f   : > { %2568 = vmatmul.mubr.f32.vlgmr.msra.gmra.mxu0 %v426_v63  ;;  %v727_v63 = vld [vmem:[#allocation7 + $0x1e8] sm:$0xff] }
 0x140   : > { %794 = vmatprep.mubr.f32.mxu0 %v3767_v56  ;;  %730 = vmatprep.subr.mxu0 %v727_v63  ;;  %v714_v63 = vld [vmem:[#allocation7 + $0x180] sm:$0xff] }
 0x141   : > { %731 = vmatpush1.msra.mxu0 %v726_v62  ;;  %v711_v62 = vld [vmem:[#allocation7 + $0x168] sm:$0xff] }
 0x1ff   : > { %v575_v61 = vpop.f32.mrf.mxu0 }
 0x200   : > { %v580_v59 = vsel %vm579_vm1, %v575_v61, -inf }
 0x201   : > { %581 = vmax.xlane.f32.xlu0 %v580_v59  ;;  %v2569_v57 = vpop.f32.mrf.mxu0  ;;  %v723_v59 = vld [vmem:[#allocation7 + $0x1c8] sm:$0xff] }
 0x202   : > { %v725_v57 = vld [vmem:[#allocation7 + $0x1d8] sm:$0xff]  ;;  %732 = vmatprep.subr.mxu0 %v723_v59  ;;  %v712_v59 = vld [vmem:[#allocation7 + $0x170] sm:$0xff] }
 0x28a   : > { %v582_v52 = vpop.xlane.xlu0 %581 }
 0x28b   : > { %v583_v55 = vsub.f32 %v575_v61, %v582_v52  ;;  %v722_v52 = vld [vmem:[#allocation7 + $0x1c0] sm:$0xff]  ;;  %v721_v61 = vld [vmem:[#allocation7 + $0x1b8] sm:$0xff] }
 0x28c   : > { %733 = vmatpush1.msra.mxu0 %v722_v52  ;;  %v706_v52 = vld [vmem:[#allocation7 + $0x140] sm:$0xff] }
 0x28d   : > { %v584_v50 = vmul.f32 1.442695, %v583_v55  ;;  %v719_v55 = vld [vmem:[#allocation7 + $0x1a8] sm:$0xff] }
 0x28e   : > { %734 = vmatprep.subr.mxu0 %v719_v55  ;;  %v703_v55 = vld [vmem:[#allocation7 + $0x128] sm:$0xff] }
 0x28f   : > { %2679 = vpow2.f32 %v584_v50  ;;  %v724_v50 = vld [vmem:[#allocation7 + $0x1d0] sm:$0xff] }
 0x29c   : > { %v2680_v60 = vpop.eup %2679 }
 0x29d   : > { %2573 = vmatmul.mubr.msk.f32.vlgmr.msra.gmra.mxu1 %vm579_vm1, %v2680_v60  ;;  %v586_v54 = vsel %vm579_vm1, %v2680_v60, 0.0  ;;  %v718_v60 = vld [vmem:[#allocation7 + $0x1a0] sm:$0xff] }
 0x29e   : > { %587 = vadd.xlane.f32.xlu0 %v586_v54  ;;  %865 = vmatprep.mubr.f32.mxu1 %v3767_v56  ;;  %v720_v54 = vld [vmem:[#allocation7 + $0x1b0] sm:$0xff]  ;;  %v715_v56 = vld [vmem:[#allocation7 + $0x188] sm:$0xff] }
 0x29f   : > { %802 = vmatpush1.msra.mxu1 %v728_v53  ;;  %735 = vmatpush1.msra.mxu0 %v718_v60  ;;  %v713_v53 = vld [vmem:[#allocation7 + $0x178] sm:$0xff]  ;;  %v702_v60 = vld [vmem:[#allocation7 + $0x120] sm:$0xff] }
 0x2a0   : > { %803 = vmatprep.subr.mxu1 %v725_v57  ;;  %736 = vmatprep.subr.mxu0 %v715_v56  ;;  %v707_v57 = vld [vmem:[#allocation7 + $0x148] sm:$0xff]  ;;  %v701_v56 = vld [vmem:[#allocation7 + $0x118] sm:$0xff] }
 0x2a1   : > { %804 = vmatpush1.msra.mxu1 %v724_v50  ;;  %737 = vmatpush1.msra.mxu0 %v714_v63  ;;  %v708_v50 = vld [vmem:[#allocation7 + $0x150] sm:$0xff]  ;;  %v698_v63 = vld [vmem:[#allocation7 + $0x100] sm:$0xff] }
 0x2a2   : > { %805 = vmatprep.subr.mxu1 %v721_v61  ;;  %738 = vmatprep.subr.mxu0 %v711_v62  ;;  %v705_v61 = vld [vmem:[#allocation7 + $0x138] sm:$0xff]  ;;  %v695_v62 = vld [vmem:[#allocation7 + $0xe8] sm:$0xff] }
 0x2a3   : > { %806 = vmatpush1.msra.mxu1 %v720_v54  ;;  %739 = vmatpush1.msra.mxu0 %v710_v51  ;;  %v704_v54 = vld [vmem:[#allocation7 + $0x130] sm:$0xff]  ;;  %v694_v51 = vld [vmem:[#allocation7 + $0xe0] sm:$0xff] }
 0x2a4   : > { %807 = vmatprep.subr.mxu1 %v717_v48  ;;  %740 = vmatprep.subr.mxu0 %v707_v57  ;;  %v699_v48 = vld [vmem:[#allocation7 + $0x108] sm:$0xff]  ;;  %v693_v57 = vld [vmem:[#allocation7 + $0xd8] sm:$0xff] }
 0x2a5   : > { %808 = vmatpush1.msra.mxu1 %v716_v0  ;;  %741 = vmatpush1.msra.mxu0 %v706_v52  ;;  %v700_v0 = vld [vmem:[#allocation7 + $0x110] sm:$0xff]  ;;  %v690_v52 = vld [vmem:[#allocation7 + $0xc0] sm:$0xff] }
 0x2a6   : > { %809 = vmatprep.subr.mxu1 %v713_v53  ;;  %742 = vmatprep.subr.mxu0 %v703_v55  ;;  %v697_v53 = vld [vmem:[#allocation7 + $0xf8] sm:$0xff]  ;;  %v687_v55 = vld [vmem:[#allocation7 + $0xa8] sm:$0xff] }
 0x2a7   : > { %810 = vmatpush1.msra.mxu1 %v712_v59  ;;  %743 = vmatpush1.msra.mxu0 %v702_v60  ;;  %v696_v59 = vld [vmem:[#allocation7 + $0xf0] sm:$0xff]  ;;  %v686_v60 = vld [vmem:[#allocation7 + $0xa0] sm:$0xff] }
 0x2a8   : > { %811 = vmatprep.subr.mxu1 %v709_v46  ;;  %744 = vmatprep.subr.mxu0 %v699_v48  ;;  %v691_v46 = vld [vmem:[#allocation7 + $0xc8] sm:$0xff] }
 0x2a9   : > { %812 = vmatpush1.msra.mxu1 %v708_v50  ;;  %745 = vmatpush1.msra.mxu0 %v698_v63  ;;  %v692_v50 = vld [vmem:[#allocation7 + $0xd0] sm:$0xff]  ;;  %v683_v48 = vld [vmem:[#allocation7 + $0x88] sm:$0xff]  ;;  %v682_v63 = vld [vmem:[#allocation7 + $0x80] sm:$0xff] }
 0x2aa   : > { %813 = vmatprep.subr.mxu1 %v705_v61  ;;  %746 = vmatprep.subr.mxu0 %v695_v62  ;;  %v689_v61 = vld [vmem:[#allocation7 + $0xb8] sm:$0xff]  ;;  %v679_v62 = vld [vmem:[#allocation7 + $0x68] sm:$0xff] }
 0x2ab   : > { %814 = vmatpush1.msra.mxu1 %v704_v54  ;;  %747 = vmatpush1.msra.mxu0 %v694_v51  ;;  %v688_v54 = vld [vmem:[#allocation7 + $0xb0] sm:$0xff]  ;;  %v678_v51 = vld [vmem:[#allocation7 + $0x60] sm:$0xff] }
 0x2ac   : > { %815 = vmatprep.subr.mxu1 %v701_v56  ;;  %748 = vmatprep.subr.mxu0 %v691_v46  ;;  %v685_v56 = vld [vmem:[#allocation7 + $0x98] sm:$0xff]  ;;  %v675_v46 = vld [vmem:[#allocation7 + $0x48] sm:$0xff] }
 0x2ad   : > { %816 = vmatpush1.msra.mxu1 %v700_v0  ;;  %749 = vmatpush1.msra.mxu0 %v690_v52  ;;  %v684_v0 = vld [vmem:[#allocation7 + $0x90] sm:$0xff]  ;;  %v674_v52 = vld [vmem:[#allocation7 + $0x40] sm:$0xff] }
 0x2ae   : > { %817 = vmatprep.subr.mxu1 %v697_v53  ;;  %750 = vmatprep.subr.mxu0 %v687_v55  ;;  %v681_v53 = vld [vmem:[#allocation7 + $0x78] sm:$0xff]  ;;  %v671_v55 = vld [vmem:[#allocation7 + $0x28] sm:$0xff] }
 0x2af   : > { %818 = vmatpush1.msra.mxu1 %v696_v59  ;;  %751 = vmatpush1.msra.mxu0 %v686_v60  ;;  %v680_v59 = vld [vmem:[#allocation7 + $0x70] sm:$0xff]  ;;  %v670_v60 = vld [vmem:[#allocation7 + $0x20] sm:$0xff] }
 0x2b0   : > { %819 = vmatprep.subr.mxu1 %v693_v57  ;;  %752 = vmatprep.subr.mxu0 %v683_v48  ;;  %v677_v57 = vld [vmem:[#allocation7 + $0x58] sm:$0xff]  ;;  %v667_v48 = vld [vmem:[#allocation7 + $0x8] sm:$0xff] }
 0x2b1   : > { %820 = vmatpush1.msra.mxu1 %v692_v50  ;;  %753 = vmatpush1.msra.mxu0 %v682_v63  ;;  %v676_v50 = vld [vmem:[#allocation7 + $0x50] sm:$0xff]  ;;  %v666_v63 = vld [vmem:[#allocation7] sm:$0xff] }
 0x2b2   : > { %821 = vmatprep.subr.mxu1 %v689_v61  ;;  %754 = vmatprep.subr.mxu0 %v679_v62  ;;  %v673_v61 = vld [vmem:[#allocation7 + $0x38] sm:$0xff] }
 0x2b3   : > { %822 = vmatpush1.msra.mxu1 %v688_v54  ;;  %755 = vmatpush1.msra.mxu0 %v678_v51  ;;  %v672_v54 = vld [vmem:[#allocation7 + $0x30] sm:$0xff] }
 0x2b4   : > { %823 = vmatprep.subr.mxu1 %v685_v56  ;;  %756 = vmatprep.subr.mxu0 %v675_v46  ;;  %v669_v56 = vld [vmem:[#allocation7 + $0x18] sm:$0xff] }
 0x2b5   : > { %824 = vmatpush1.msra.mxu1 %v684_v0  ;;  %757 = vmatpush1.msra.mxu0 %v674_v52  ;;  %v668_v0 = vld [vmem:[#allocation7 + $0x10] sm:$0xff] }
 0x2b6   : > { %825 = vmatprep.subr.mxu1 %v681_v53  ;;  %758 = vmatprep.subr.mxu0 %v671_v55 }
 0x2b7   : > { %826 = vmatpush1.msra.mxu1 %v680_v59  ;;  %759 = vmatpush1.msra.mxu0 %v670_v60 }
 0x2b8   : > { %827 = vmatprep.subr.mxu1 %v677_v57  ;;  %760 = vmatprep.subr.mxu0 %v667_v48 }
 0x2b9   : > { %828 = vmatpush1.msra.mxu1 %v676_v50  ;;  %761 = vmatpush1.msra.mxu0 %v666_v63  ;;  %v1240_v63 = vld [vmem:[#allocation7 + $0x3e8] sm:$0xff] }
 0x2ba   : > { %829 = vmatprep.subr.mxu1 %v673_v61  ;;  %879 = vmatprep.subr.mxu0 %v3111_v5  ;;  %v3773_v5 = vld [vmem:[#allocation14_spill] sm:$0xff] }
 0x2bb   : > { %830 = vmatpush1.msra.mxu1 %v672_v54 }
 0x2bc   : > { %831 = vmatprep.subr.mxu1 %v669_v56 }
 0x2bd   : > { %832 = vmatpush1.msra.mxu1 %v668_v0  ;;  %v1242_v0 = vld [vmem:[#allocation7 + $0x3f8] sm:$0xff] }
 0x2be   : > { %950 = vmatprep.subr.mxu1 %v3102_v1  ;;  %v3769_v1 = vld [vmem:[#allocation12_spill] sm:$0xff] }
 0x327   : > { %v588_v62 = vpop.xlane.xlu0 %587 }
 0x328   : > { %2681 = vrcp.f32 %v588_v62  ;;  %v1239_v62 = vld [vmem:[#allocation7 + $0x3e0] sm:$0xff] }
 0x335   : > { %v2682_v53 = vpop.eup %2681 }
 0x35d   : > { %v658_v51 = vpop.f32.mrf.mxu1 }
 0x35e   : > { %v663_v59 = vmul.f32 %v2682_v53, %v658_v51  ;;  %v1241_v53 = vld [vmem:[#allocation7 + $0x3f0] sm:$0xff]  ;;  %v1236_v51 = vld [vmem:[#allocation7 + $0x3c8] sm:$0xff] }
 0x35f   : > { %v2574_v46 = vpop.f32.mrf.mxu1 }
 0x360   : > { %v3317_v57 = vadd.f32 %v663_v59, %v3308_v58  ;;  %v1238_v59 = vld [vmem:[#allocation7 + $0x3d8] sm:$0xff]  ;;  %v1235_v46 = vld [vmem:[#allocation7 + $0x3c0] sm:$0xff] }
 0x362   : > { %v665_v52 = vmax.f32 %v3317_v57, 0.0 }
 0x364   : > { %795 = vmatmul.mubr.f32.vlgmr.msra.gmra.mxu0 %v665_v52  ;;  %866 = vmatmul.mubr.f32.vlgmr.msra.gmra.mxu1 %v665_v52  ;;  %v1232_v52 = vld [vmem:[#allocation7 + $0x3a8] sm:$0xff] }
 0x365   : > { %880 = vmatpush1.msra.mxu0 %v3117_v7  ;;  %951 = vmatpush1.msra.mxu1 %v3104_v2  ;;  %v3770_v2 = vld [vmem:[#allocation15_spill] sm:$0xff]  ;;  %v3775_v7 = vld [vmem:[#allocation16_spill] sm:$0xff] }
 0x366   : > { %881 = vmatprep.subr.mxu0 %v3123_v9  ;;  %952 = vmatprep.subr.mxu1 %v3106_v3  ;;  %v3771_v3 = vld [vmem:[#allocation13_spill] sm:$0xff]  ;;  %v3777_v9 = vld [vmem:[#allocation18_spill] sm:$0xff] }
 0x367   : > { %882 = vmatpush1.msra.mxu0 %v3125_v10  ;;  %953 = vmatpush1.msra.mxu1 %v3109_v4  ;;  %v3772_v4 = vld [vmem:[#allocation17_spill] sm:$0xff] }
 0x368   : > { %883 = vmatprep.subr.mxu0 %v3131_v12  ;;  %954 = vmatprep.subr.mxu1 %v3114_v6  ;;  %v3774_v6 = vld [vmem:[#allocation19_spill] sm:$0xff]  ;;  %v2537_v10 = vld [vmem:[%s3090_s8 + $0x8] sm:$0xff]  ;;  %v3779_v12 = vld [vmem:[#allocation20_spill] sm:$0xff] }
 0x369   : > { %884 = vmatpush1.msra.mxu0 %v3137_v14  ;;  %955 = vmatpush1.msra.mxu1 %v3120_v8  ;;  %v3776_v8 = vld [vmem:[#allocation21_spill] sm:$0xff]  ;;  %v3781_v14 = vld [vmem:[#allocation22_spill] sm:$0xff] }
 0x36a   : > { %885 = vmatprep.subr.mxu0 %v3139_v15  ;;  %956 = vmatprep.subr.mxu1 %v3128_v11  ;;  %v3778_v11 = vld [vmem:[#allocation23_spill] sm:$0xff] }
 0x36b   : > { %886 = vmatpush1.msra.mxu0 %v3145_v17  ;;  %957 = vmatpush1.msra.mxu1 %v3134_v13  ;;  %v3780_v13 = vld [vmem:[#allocation25_spill] sm:$0xff]  ;;  %v3782_v15 = vld [vmem:[#allocation27_spill] sm:$0xff]  ;;  %v878_v17 = vadd.f32 %v2537_v10, %v3317_v57  ;;  %v1237_v57 = vld [vmem:[#allocation7 + $0x3d0] sm:$0xff] }
 0x36c   : > { %887 = vmatprep.subr.mxu0 %v3151_v19  ;;  %958 = vmatprep.subr.mxu1 %v3142_v16  ;;  %v3783_v16 = vld [vmem:[#allocation24_spill] sm:$0xff]  ;;  %v3785_v19 = vmov 0.0   ;;  %v1234_v10 = vld [vmem:[#allocation7 + $0x3b8] sm:$0xff] }
 0x36d   : > { %888 = vmatpush1.msra.mxu0 %v3157_v21  ;;  %959 = vmatpush1.msra.mxu1 %v3148_v18  ;;  %v3784_v18 = vld [vmem:[#allocation28_spill] sm:$0xff] }
 0x36e   : > { %889 = vmatprep.subr.mxu0 %v3163_v23  ;;  %960 = vmatprep.subr.mxu1 %v3154_v20  ;;  %v3786_v20 = vld [vmem:[#allocation26_spill] sm:$0xff] }
 0x36f   : > { %890 = vmatpush1.msra.mxu0 %v3169_v25  ;;  %961 = vmatpush1.msra.mxu1 %v3160_v22 }
 0x370   : > { %891 = vmatprep.subr.mxu0 %v3175_v27  ;;  %962 = vmatprep.subr.mxu1 %v3166_v24 }
 0x371   : > { %892 = vmatpush1.msra.mxu0 %v3181_v29  ;;  %963 = vmatpush1.msra.mxu1 %v3172_v26  ;;  %v3787_v26 = vld [vmem:[#allocation29_spill] sm:$0xff] }
 0x372   : > { %893 = vmatprep.subr.mxu0 %v3187_v31  ;;  %964 = vmatprep.subr.mxu1 %v3178_v28 }
 0x373   : > { %894 = vmatpush1.msra.mxu0 %v3193_v33  ;;  %965 = vmatpush1.msra.mxu1 %v3184_v30 }
 0x374   : > { %895 = vmatprep.subr.mxu0 %v3199_v35  ;;  %966 = vmatprep.subr.mxu1 %v3190_v32 }
 0x375   : > { %896 = vmatpush1.msra.mxu0 %v3205_v37  ;;  %967 = vmatpush1.msra.mxu1 %v3196_v34 }
 0x376   : > { %897 = vmatprep.subr.mxu0 %v3211_v39  ;;  %968 = vmatprep.subr.mxu1 %v3202_v36 }
 0x377   : > { %898 = vmatpush1.msra.mxu0 %v3217_v41  ;;  %969 = vmatpush1.msra.mxu1 %v3208_v38 }
 0x378   : > { %899 = vmatprep.subr.mxu0 %v3223_v43  ;;  %970 = vmatprep.subr.mxu1 %v3214_v40 }
 0x379   : > { %900 = vmatpush1.msra.mxu0 %v3229_v45  ;;  %971 = vmatpush1.msra.mxu1 %v3220_v42 }
 0x37a   : > { %901 = vmatprep.subr.mxu0 %v3235_v47  ;;  %972 = vmatprep.subr.mxu1 %v3226_v44 }
 0x37b   : > { %902 = vmatpush1.msra.mxu0 %v3241_v49  ;;  %973 = vmatpush1.msra.mxu1 %v3769_v1 }
 0x37c   : > { %903 = vmatprep.subr.mxu0 %v3770_v2  ;;  %974 = vmatprep.subr.mxu1 %v3771_v3 }
 0x37d   : > { %904 = vmatpush1.msra.mxu0 %v3772_v4  ;;  %975 = vmatpush1.msra.mxu1 %v3773_v5 }
 0x37e   : > { %905 = vmatprep.subr.mxu0 %v3774_v6  ;;  %976 = vmatprep.subr.mxu1 %v3775_v7 }
 0x37f   : > { %906 = vmatpush1.msra.mxu0 %v3776_v8  ;;  %977 = vmatpush1.msra.mxu1 %v3777_v9 }
 0x380   : > { %907 = vmatprep.subr.mxu0 %v3778_v11  ;;  %978 = vmatprep.subr.mxu1 %v3779_v12 }
 0x381   : > { %908 = vmatpush1.msra.mxu0 %v3780_v13  ;;  %979 = vmatpush1.msra.mxu1 %v3781_v14 }
 0x382   : > { %909 = vmatprep.subr.mxu0 %v3782_v15  ;;  %980 = vmatprep.subr.mxu1 %v3783_v16 }
 0x383   : > { %910 = vmatpush1.msra.mxu0 %v3784_v18  ;;  %943 = vmatprep.mubr.f32.mxu0 %v3785_v19 }
 0x384   : > { %981 = vmatpush1.msra.mxu1 %v3786_v20  ;;  %1014 = vmatprep.mubr.f32.mxu1 %v3785_v19 }
 0x385   : > { %944 = vmatmul.mubr.f32.vlgmr.msra.gmra.mxu0 %v878_v17  ;;  %1015 = vmatmul.mubr.f32.vlgmr.msra.gmra.mxu1 %v878_v17  ;;  %v1231_v17 = vld [vmem:[#allocation7 + $0x3a0] sm:$0xff] }
 0x386   : > { %2580 = vmatprep.subr.mxu1 %v3785_v19  ;;  %2575 = vmatprep.subr.mxu0 %v3785_v19 }
 0x387   : > { %2577 = vmatprep.mubr.msk.f32.mxu0 %vm2919_vm0, %v3785_v19  ;;  %2582 = vmatprep.mubr.msk.f32.mxu1 %vm2919_vm0, %v3785_v19 }
 0x424   : > { %v3392_v21 = vpop.f32.mrf.mxu1  ;;  %v3396_v24 = vpop.f32.mrf.mxu0 }
 0x426   : > { %v3394_v22 = vpop.f32.mrf.mxu1  ;;  %v3399_v28 = vpop.f32.mrf.mxu0 }
 0x445   : > { %v1016_v23 = vpop.f32.mrf.mxu1  ;;  %v945_v30 = vpop.f32.mrf.mxu0 }
 0x446   : > { %2581 = vmatpush3.msra.mxu1 %v1016_v23  ;;  %v1233_v23 = vld [vmem:[#allocation7 + $0x3b0] sm:$0xff] }
 0x447   : > { %v1018_v25 = vpop.f32.mrf.mxu1  ;;  %v3402_v32 = vpop.f32.mrf.mxu0  ;;  %1314 = vmatprep.subr.mxu1 %v1242_v0  ;;  %v1216_v0 = vld [vmem:[#allocation7 + $0x328] sm:$0xff] }
 0x448   : > { %v1021_v27 = vadd.f32 %v3787_v26, %v1018_v25  ;;  %v1228_v25 = vld [vmem:[#allocation7 + $0x388] sm:$0xff] }
 0x44a   : > { %2576 = vmatpush3.xpose.msra.mxu0 %v1021_v27  ;;  %v1230_v27 = vld [vmem:[#allocation7 + $0x398] sm:$0xff] }
 0x44b   : > { %1243 = vmatprep.subr.mxu0 %v1240_v63  ;;  %v1221_v63 = vld [vmem:[#allocation7 + $0x350] sm:$0xff] }
 0x44d   : > { %2578 = vmatmul.mubr.f32.vlgmr.msra.gmra.mxu0 %v945_v30  ;;  %v1227_v30 = vld [vmem:[#allocation7 + $0x380] sm:$0xff] }
 0x44e   : > { %1307 = vmatprep.mubr.f32.mxu0 %v3785_v19  ;;  %1244 = vmatpush1.msra.mxu0 %v1239_v62  ;;  %v1218_v62 = vld [vmem:[#allocation7 + $0x338] sm:$0xff] }
 0x44f   : > { %1245 = vmatprep.subr.mxu0 %v1236_v51  ;;  %v1217_v51 = vld [vmem:[#allocation7 + $0x330] sm:$0xff] }
 0x450   : > { %1246 = vmatpush1.msra.mxu0 %v1235_v46  ;;  %v1214_v46 = vld [vmem:[#allocation7 + $0x318] sm:$0xff] }
 0x451   : > { %1247 = vmatprep.subr.mxu0 %v1232_v52  ;;  %v1213_v52 = vld [vmem:[#allocation7 + $0x310] sm:$0xff] }
 0x452   : > { %1248 = vmatpush1.msra.mxu0 %v1231_v17  ;;  %v1210_v17 = vld [vmem:[#allocation7 + $0x2f8] sm:$0xff] }
 0x453   : > { %1249 = vmatprep.subr.mxu0 %v1228_v25  ;;  %v1209_v25 = vld [vmem:[#allocation7 + $0x2f0] sm:$0xff] }
 0x454   : > { %1250 = vmatpush1.msra.mxu0 %v1227_v30  ;;  %v1206_v30 = vld [vmem:[#allocation7 + $0x2d8] sm:$0xff] }
 0x50d   : > { %v1088_v58 = vpop.f32.mrf.mxu0 }
 0x50e   : > { %v1092_v50 = vsel %vm579_vm1, %v1088_v58, -inf }
 0x50f   : > { %1093 = vmax.xlane.f32.xlu1 %v1092_v50  ;;  %v2579_v55 = vpop.f32.mrf.mxu0  ;;  %v1224_v50 = vld [vmem:[#allocation7 + $0x368] sm:$0xff] }
 0x510   : > { %v1226_v55 = vld [vmem:[#allocation7 + $0x378] sm:$0xff]  ;;  %1251 = vmatprep.subr.mxu0 %v1224_v50  ;;  %v1205_v50 = vld [vmem:[#allocation7 + $0x2d0] sm:$0xff] }
 0x598   : > { %v1094_v61 = vpop.xlane.xlu1 %1093 }
 0x599   : > { %v1095_v60 = vsub.f32 %v1088_v58, %v1094_v61  ;;  %v1229_v58 = vld [vmem:[#allocation7 + $0x390] sm:$0xff]  ;;  %v1223_v61 = vld [vmem:[#allocation7 + $0x360] sm:$0xff] }
 0x59a   : > { %1252 = vmatpush1.msra.mxu0 %v1223_v61  ;;  %v1202_v61 = vld [vmem:[#allocation7 + $0x2b8] sm:$0xff] }
 0x59b   : > { %v1096_v54 = vmul.f32 1.442695, %v1095_v60  ;;  %v1225_v60 = vld [vmem:[#allocation7 + $0x370] sm:$0xff] }
 0x59d   : > { %2683 = vpow2.f32 %v1096_v54  ;;  %v1220_v54 = vld [vmem:[#allocation7 + $0x348] sm:$0xff] }
 0x59e   : > { %1253 = vmatprep.subr.mxu0 %v1220_v54  ;;  %v1201_v54 = vld [vmem:[#allocation7 + $0x2b0] sm:$0xff] }
 0x5aa   : > { %v2684_v48 = vpop.eup %2683 }
 0x5ab   : > { %2583 = vmatmul.mubr.msk.f32.vlgmr.msra.gmra.mxu1 %vm579_vm1, %v2684_v48  ;;  %v1098_v56 = vsel %vm579_vm1, %v2684_v48, 0.0  ;;  %v1222_v48 = vld [vmem:[#allocation7 + $0x358] sm:$0xff] }
 0x5ac   : > { %1099 = vadd.xlane.f32.xlu1 %v1098_v56  ;;  %1378 = vmatprep.mubr.f32.mxu1 %v3785_v19  ;;  %v1219_v56 = vld [vmem:[#allocation7 + $0x340] sm:$0xff] }
 0x5ad   : > { %1315 = vmatpush1.msra.mxu1 %v1241_v53  ;;  %v1215_v53 = vld [vmem:[#allocation7 + $0x320] sm:$0xff]  ;;  %1254 = vmatpush1.msra.mxu0 %v1219_v56  ;;  %v1198_v56 = vld [vmem:[#allocation7 + $0x298] sm:$0xff] }
 0x5ae   : > { %1316 = vmatprep.subr.mxu1 %v1238_v59  ;;  %v1212_v59 = vld [vmem:[#allocation7 + $0x308] sm:$0xff]  ;;  %1255 = vmatprep.subr.mxu0 %v1216_v0  ;;  %v1197_v0 = vld [vmem:[#allocation7 + $0x290] sm:$0xff] }
 0x5af   : > { %1317 = vmatpush1.msra.mxu1 %v1237_v57  ;;  %v1211_v57 = vld [vmem:[#allocation7 + $0x300] sm:$0xff]  ;;  %1256 = vmatpush1.msra.mxu0 %v1215_v53  ;;  %v1194_v53 = vld [vmem:[#allocation7 + $0x278] sm:$0xff] }
 0x5b0   : > { %1318 = vmatprep.subr.mxu1 %v1234_v10  ;;  %v1208_v10 = vld [vmem:[#allocation7 + $0x2e8] sm:$0xff]  ;;  %1257 = vmatprep.subr.mxu0 %v1212_v59  ;;  %v1193_v59 = vld [vmem:[#allocation7 + $0x270] sm:$0xff] }
 0x5b1   : > { %1319 = vmatpush1.msra.mxu1 %v1233_v23  ;;  %v1207_v23 = vld [vmem:[#allocation7 + $0x2e0] sm:$0xff]  ;;  %1258 = vmatpush1.msra.mxu0 %v1211_v57  ;;  %v1190_v57 = vld [vmem:[#allocation7 + $0x258] sm:$0xff] }
 0x5b2   : > { %1320 = vmatprep.subr.mxu1 %v1230_v27  ;;  %v1204_v27 = vld [vmem:[#allocation7 + $0x2c8] sm:$0xff]  ;;  %1259 = vmatprep.subr.mxu0 %v1208_v10  ;;  %v1189_v10 = vld [vmem:[#allocation7 + $0x250] sm:$0xff] }
 0x5b3   : > { %1321 = vmatpush1.msra.mxu1 %v1229_v58  ;;  %v1203_v58 = vld [vmem:[#allocation7 + $0x2c0] sm:$0xff]  ;;  %1260 = vmatpush1.msra.mxu0 %v1207_v23  ;;  %v1186_v23 = vld [vmem:[#allocation7 + $0x238] sm:$0xff] }
 0x5b4   : > { %1322 = vmatprep.subr.mxu1 %v1226_v55  ;;  %v1200_v55 = vld [vmem:[#allocation7 + $0x2a8] sm:$0xff]  ;;  %1261 = vmatprep.subr.mxu0 %v1204_v27  ;;  %v1185_v27 = vld [vmem:[#allocation7 + $0x230] sm:$0xff] }
 0x5b5   : > { %1323 = vmatpush1.msra.mxu1 %v1225_v60  ;;  %v1199_v60 = vld [vmem:[#allocation7 + $0x2a0] sm:$0xff]  ;;  %1262 = vmatpush1.msra.mxu0 %v1203_v58  ;;  %v1182_v58 = vld [vmem:[#allocation7 + $0x218] sm:$0xff] }
 0x5b6   : > { %1324 = vmatprep.subr.mxu1 %v1222_v48  ;;  %v1196_v48 = vld [vmem:[#allocation7 + $0x288] sm:$0xff]  ;;  %1263 = vmatprep.subr.mxu0 %v1200_v55  ;;  %v1181_v55 = vld [vmem:[#allocation7 + $0x210] sm:$0xff] }
 0x5b7   : > { %1325 = vmatpush1.msra.mxu1 %v1221_v63  ;;  %v1195_v63 = vld [vmem:[#allocation7 + $0x280] sm:$0xff]  ;;  %1264 = vmatpush1.msra.mxu0 %v1199_v60  ;;  %v3411_v60 = vld [vmem:[#allocation5 + $0x1f8] sm:$0xff] }
 0x5b8   : > { %1326 = vmatprep.subr.mxu1 %v1218_v62  ;;  %v1192_v62 = vld [vmem:[#allocation7 + $0x268] sm:$0xff]  ;;  %1265 = vmatprep.subr.mxu0 %v1196_v48 }
 0x5b9   : > { %1327 = vmatpush1.msra.mxu1 %v1217_v51  ;;  %v1191_v51 = vld [vmem:[#allocation7 + $0x260] sm:$0xff]  ;;  %1266 = vmatpush1.msra.mxu0 %v1195_v63 }
 0x5ba   : > { %1328 = vmatprep.subr.mxu1 %v1214_v46  ;;  %1267 = vmatprep.subr.mxu0 %v1192_v62  ;;  %v1188_v46 = vld [vmem:[#allocation7 + $0x248] sm:$0xff] }
 0x5bb   : > { %1329 = vmatpush1.msra.mxu1 %v1213_v52  ;;  %1268 = vmatpush1.msra.mxu0 %v1191_v51  ;;  %v1187_v52 = vld [vmem:[#allocation7 + $0x240] sm:$0xff] }
 0x5bc   : > { %1330 = vmatprep.subr.mxu1 %v1210_v17  ;;  %1269 = vmatprep.subr.mxu0 %v1188_v46  ;;  %v1184_v17 = vld [vmem:[#allocation7 + $0x228] sm:$0xff]  ;;  %v3418_v51 = vld [vmem:[#allocation5 + $0x1e0] sm:$0xff] }
 0x5bd   : > { %1331 = vmatpush1.msra.mxu1 %v1209_v25  ;;  %1270 = vmatpush1.msra.mxu0 %v1187_v52  ;;  %v1183_v25 = vld [vmem:[#allocation7 + $0x220] sm:$0xff]  ;;  %v3424_v46 = vld [vmem:[#allocation5 + $0x1c8] sm:$0xff]  ;;  %v3433_v52 = vld [vmem:[#allocation5 + $0x1d0] sm:$0xff] }
 0x5be   : > { %1332 = vmatprep.subr.mxu1 %v1206_v30  ;;  %1271 = vmatprep.subr.mxu0 %v1184_v17  ;;  %v1180_v30 = vld [vmem:[#allocation7 + $0x208] sm:$0xff]  ;;  %v3439_v17 = vld [vmem:[#allocation5 + $0x1b8] sm:$0xff] }
 0x5bf   : > { %1333 = vmatpush1.msra.mxu1 %v1205_v50  ;;  %1272 = vmatpush1.msra.mxu0 %v1183_v25  ;;  %v1179_v50 = vld [vmem:[#allocation7 + $0x200] sm:$0xff]  ;;  %v3445_v25 = vld [vmem:[#allocation5 + $0x1b0] sm:$0xff] }
 0x5c0   : > { %1334 = vmatprep.subr.mxu1 %v1202_v61  ;;  %1273 = vmatprep.subr.mxu0 %v1180_v30  ;;  %v3408_v61 = vld [vmem:[#allocation5 + $0x1e8] sm:$0xff]  ;;  %v3451_v30 = vld [vmem:[#allocation5 + $0x198] sm:$0xff] }
 0x5c1   : > { %1335 = vmatpush1.msra.mxu1 %v1201_v54  ;;  %1274 = vmatpush1.msra.mxu0 %v1179_v50  ;;  %v3457_v50 = vld [vmem:[#allocation5 + $0x190] sm:$0xff] }
 0x5c2   : > { %1336 = vmatprep.subr.mxu1 %v1198_v56  ;;  %1392 = vmatprep.subr.mxu0 %v3408_v61 }
 0x5c3   : > { %1337 = vmatpush1.msra.mxu1 %v1197_v0 }
 0x5c4   : > { %1338 = vmatprep.subr.mxu1 %v1194_v53 }
 0x5c5   : > { %1339 = vmatpush1.msra.mxu1 %v1193_v59  ;;  %v3421_v59 = vld [vmem:[#allocation5 + $0x1f0] sm:$0xff] }
 0x5c6   : > { %1340 = vmatprep.subr.mxu1 %v1190_v57  ;;  %v3427_v57 = vld [vmem:[#allocation5 + $0x1d8] sm:$0xff] }
 0x5c7   : > { %1341 = vmatpush1.msra.mxu1 %v1189_v10  ;;  %v3436_v10 = vld [vmem:[#allocation5 + $0x1a8] sm:$0xff] }
 0x5c8   : > { %1342 = vmatprep.subr.mxu1 %v1186_v23  ;;  %v3442_v23 = vld [vmem:[#allocation5 + $0x1a0] sm:$0xff] }
 0x5c9   : > { %1343 = vmatpush1.msra.mxu1 %v1185_v27  ;;  %v3448_v27 = vld [vmem:[#allocation5 + $0x188] sm:$0xff] }
 0x5ca   : > { %1344 = vmatprep.subr.mxu1 %v1182_v58  ;;  %v3454_v58 = vld [vmem:[#allocation5 + $0x180] sm:$0xff] }
 0x5cb   : > { %1345 = vmatpush1.msra.mxu1 %v1181_v55  ;;  %v3460_v55 = vld [vmem:[#allocation5 + $0x168] sm:$0xff] }
 0x5cc   : > { %1463 = vmatprep.subr.mxu1 %v3411_v60 }
 0x635   : > { %v1100_v54 = vpop.xlane.xlu1 %1099 }
 0x636   : > { %2685 = vrcp.f32 %v1100_v54  ;;  %v3463_v54 = vld [vmem:[#allocation5 + $0x178] sm:$0xff] }
 0x637   : > { %3788 = vst [vmem:[#allocation12_spill] sm:$0xff] %v3463_v54 }
 0x643   : > { %v2686_v48 = vpop.eup %2685 }
 0x66b   : > { %v1170_v56 = vpop.f32.mrf.mxu1 }
 0x66c   : > { %v1175_v63 = vmul.f32 %v2686_v48, %v1170_v56  ;;  %v3466_v48 = vld [vmem:[#allocation5 + $0x160] sm:$0xff]  ;;  %v3469_v56 = vld [vmem:[#allocation5 + $0x170] sm:$0xff] }
 0x66d   : > { %v2584_v0 = vpop.f32.mrf.mxu1  ;;  %3789 = vst [vmem:[#allocation15_spill] sm:$0xff] %v3466_v48  ;;  %3790 = vst [vmem:[#allocation13_spill] sm:$0xff] %v3469_v56 }
 0x66e   : > { %v3415_v62 = vadd.f32 %v1175_v63, %v3402_v32  ;;  %v3430_v32 = vld [vmem:[#allocation5 + $0x1c0] sm:$0xff]  ;;  %v3472_v63 = vld [vmem:[#allocation5 + $0x148] sm:$0xff]  ;;  %v3475_v0 = vld [vmem:[#allocation5 + $0x158] sm:$0xff] }
 0x66f   : > { %3791 = vst [vmem:[#allocation17_spill] sm:$0xff] %v3472_v63 }
 0x670   : > { %v1177_v53 = vmax.f32 %v3415_v62, 0.0 }
 0x672   : > { %1308 = vmatmul.mubr.f32.vlgmr.msra.gmra.mxu0 %v1177_v53  ;;  %1379 = vmatmul.mubr.f32.vlgmr.msra.gmra.mxu1 %v1177_v53  ;;  %v3478_v53 = vld [vmem:[#allocation5 + $0x140] sm:$0xff] }
 0x673   : > { %1393 = vmatpush1.msra.mxu0 %v3418_v51  ;;  %1464 = vmatpush1.msra.mxu1 %v3421_v59  ;;  %3792 = vst [vmem:[#allocation14_spill] sm:$0xff] %v3478_v53 }
 0x674   : > { %1394 = vmatprep.subr.mxu0 %v3424_v46  ;;  %1465 = vmatprep.subr.mxu1 %v3427_v57 }
 0x675   : > { %1395 = vmatpush1.msra.mxu0 %v3430_v32  ;;  %1466 = vmatpush1.msra.mxu1 %v3433_v52 }
 0x676   : > { %1396 = vmatprep.subr.mxu0 %v3436_v10  ;;  %1467 = vmatprep.subr.mxu1 %v3439_v17 }
 0x677   : > { %1397 = vmatpush1.msra.mxu0 %v3442_v23  ;;  %1468 = vmatpush1.msra.mxu1 %v3445_v25 }
 0x678   : > { %1398 = vmatprep.subr.mxu0 %v3448_v27  ;;  %1469 = vmatprep.subr.mxu1 %v3451_v30 }
 0x679   : > { %1399 = vmatpush1.msra.mxu0 %v3454_v58  ;;  %1470 = vmatpush1.msra.mxu1 %v3457_v50 }
 0x67a   : > { %1400 = vmatprep.subr.mxu0 %v3460_v55  ;;  %1471 = vmatprep.subr.mxu1 %v3463_v54  ;;  %v3481_v54 = vld [vmem:[#allocation5 + $0x150] sm:$0xff] }
 0x67b   : > { %1401 = vmatpush1.msra.mxu0 %v3466_v48  ;;  %1472 = vmatpush1.msra.mxu1 %v3469_v56  ;;  %3793 = vst [vmem:[#allocation19_spill] sm:$0xff] %v3481_v54  ;;  %v3484_v48 = vld [vmem:[#allocation5 + $0x128] sm:$0xff]  ;;  %v3487_v56 = vld [vmem:[#allocation5 + $0x138] sm:$0xff] }
 0x67c   : > { %1402 = vmatprep.subr.mxu0 %v3472_v63  ;;  %1473 = vmatprep.subr.mxu1 %v3475_v0  ;;  %3794 = vst [vmem:[#allocation16_spill] sm:$0xff] %v3487_v56  ;;  %v3491_v63 = vld [vmem:[#allocation5 + $0x130] sm:$0xff] }
 0x67d   : > { %1403 = vmatpush1.msra.mxu0 %v3478_v53  ;;  %1474 = vmatpush1.msra.mxu1 %v3481_v54  ;;  %v3495_v53 = vld [vmem:[#allocation5 + $0x118] sm:$0xff]  ;;  %v3499_v54 = vld [vmem:[#allocation5 + $0x110] sm:$0xff] }
 0x67e   : > { %1404 = vmatprep.subr.mxu0 %v3484_v48  ;;  %1475 = vmatprep.subr.mxu1 %v3487_v56  ;;  %v3503_v56 = vld [vmem:[#allocation5 + $0xf8] sm:$0xff] }
 0x67f   : > { %1405 = vmatpush1.msra.mxu0 %v3181_v29  ;;  %1476 = vmatpush1.msra.mxu1 %v3491_v63  ;;  %v2539_v29 = vld [vmem:[%s3090_s8 + $0x10] sm:$0xff] }
 0x680   : > { %1406 = vmatprep.subr.mxu0 %v3187_v31  ;;  %1477 = vmatprep.subr.mxu1 %v3495_v53  ;;  %v1391_v31 = vadd.f32 %v2539_v29, %v3415_v62  ;;  %v1755_v62 = vld [vmem:[#allocation7 + $0x5f8] sm:$0xff]  ;;  %v1752_v29 = vld [vmem:[#allocation7 + $0x5e0] sm:$0xff] }
 0x681   : > { %1407 = vmatpush1.msra.mxu0 %v3193_v33  ;;  %1478 = vmatpush1.msra.mxu1 %v3499_v54  ;;  %v338_v33 = vlaneseq }
 0x682   : > { %1408 = vmatprep.subr.mxu0 %v3199_v35  ;;  %1479 = vmatprep.subr.mxu1 %v3503_v56 }
 0x683   : > { %1409 = vmatpush1.msra.mxu0 %v3205_v37  ;;  %1480 = vmatpush1.msra.mxu1 %v3196_v34  ;;  %v339_v34 = vshrl.u32 %v338_v33, 7  ;;  %v336_v37 = vld [vmem:[%s3687_s4] sm:$0xf]  ;;  %v1749_v33 = vld [vmem:[#allocation7 + $0x5c8] sm:$0xff] }
 0x684   : > { %1410 = vmatprep.subr.mxu0 %v3211_v39  ;;  %1481 = vmatprep.subr.mxu1 %v3202_v36 }
 0x685   : > { %1411 = vmatpush1.msra.mxu0 %v3217_v41  ;;  %1482 = vmatpush1.msra.mxu1 %v3208_v38  ;;  %v340_v35 = vsub.s32 0, %v339_v34  ;;  %v348_v36 = vsub.s32 2, %v339_v34  ;;  %v344_v38 = vsub.s32 1, %v339_v34  ;;  %v352_v39 = vsub.s32 3, %v339_v34  ;;  %v1751_v34 = vld [vmem:[#allocation7 + $0x5d8] sm:$0xff] }
 0x686   : > { %1412 = vmatprep.subr.mxu0 %v3223_v43  ;;  %1483 = vmatprep.subr.mxu1 %v3214_v40 }
 0x687   : > { %1413 = vmatpush1.msra.mxu0 %v3229_v45  ;;  %1484 = vmatpush1.msra.mxu1 %v3220_v42  ;;  %v341_v40 = vrot.slane %v336_v37, %v340_v35  ;;  %v349_v41 = vrot.slane %v336_v37, %v348_v36  ;;  %v345_v42 = vrot.slane %v336_v37, %v344_v38  ;;  %v1748_v35 = vld [vmem:[#allocation7 + $0x5c0] sm:$0xff]  ;;  %v1750_v36 = vld [vmem:[#allocation7 + $0x5d0] sm:$0xff]  ;;  %v1747_v38 = vld [vmem:[#allocation7 + $0x5b8] sm:$0xff] }
 0x688   : > { %1414 = vmatprep.subr.mxu0 %v3235_v47  ;;  %1485 = vmatprep.subr.mxu1 %v3226_v44  ;;  %v353_v43 = vrot.slane %v336_v37, %v352_v39  ;;  %v1745_v37 = vld [vmem:[#allocation7 + $0x5a8] sm:$0xff]  ;;  %v1744_v39 = vld [vmem:[#allocation7 + $0x5a0] sm:$0xff] }
 0x689   : > { %1415 = vmatpush1.msra.mxu0 %v3241_v49  ;;  %1486 = vmatpush1.msra.mxu1 %v3769_v1  ;;  %v872_v44 = vadd.f32 %v3396_v24, %v341_v40  ;;  %v874_v45 = vadd.f32 %v3392_v21, %v349_v41  ;;  %v873_v1 = vadd.f32 %v3399_v28, %v345_v42  ;;  %v1753_v28 = vld [vmem:[#allocation7 + $0x5e8] sm:$0xff]  ;;  %v1746_v40 = vld [vmem:[#allocation7 + $0x5b0] sm:$0xff]  ;;  %v1743_v42 = vld [vmem:[#allocation7 + $0x598] sm:$0xff] }
 0x68a   : > { %1416 = vmatprep.subr.mxu0 %v3770_v2  ;;  %1487 = vmatprep.subr.mxu1 %v3771_v3  ;;  %v875_v2 = vadd.f32 %v3394_v22, %v353_v43  ;;  %v1741_v41 = vld [vmem:[#allocation7 + $0x588] sm:$0xff]  ;;  %v1740_v43 = vld [vmem:[#allocation7 + $0x580] sm:$0xff] }
 0x68b   : > { %1417 = vmatpush1.msra.mxu0 %v3772_v4  ;;  %1488 = vmatpush1.msra.mxu1 %v3773_v5 }
 0x68c   : > { %1418 = vmatprep.subr.mxu0 %v3774_v6  ;;  %1489 = vmatprep.subr.mxu1 %v3775_v7 }
 0x68d   : > { %1419 = vmatpush1.msra.mxu0 %v3776_v8  ;;  %1490 = vmatpush1.msra.mxu1 %v3777_v9 }
 0x68e   : > { %1420 = vmatprep.subr.mxu0 %v3778_v11  ;;  %1491 = vmatprep.subr.mxu1 %v3779_v12 }
 0x68f   : > { %1421 = vmatpush1.msra.mxu0 %v3780_v13  ;;  %1492 = vmatpush1.msra.mxu1 %v3781_v14 }
 0x690   : > { %1422 = vmatprep.subr.mxu0 %v3782_v15  ;;  %1493 = vmatprep.subr.mxu1 %v3783_v16 }
 0x691   : > { %1423 = vmatpush1.msra.mxu0 %v3784_v18  ;;  %1456 = vmatprep.mubr.f32.mxu0 %v3785_v19 }
 0x692   : > { %1494 = vmatpush1.msra.mxu1 %v3786_v20  ;;  %1527 = vmatprep.mubr.f32.mxu1 %v3785_v19 }
 0x693   : > { %1457 = vmatmul.mubr.f32.vlgmr.msra.gmra.mxu0 %v1391_v31  ;;  %1528 = vmatmul.mubr.f32.vlgmr.msra.gmra.mxu1 %v1391_v31  ;;  %v1754_v31 = vld [vmem:[#allocation7 + $0x5f0] sm:$0xff] }
 0x694   : > { %2590 = vmatprep.subr.mxu1 %v3785_v19  ;;  %2585 = vmatprep.subr.mxu0 %v3785_v19 }
 0x695   : > { %2587 = vmatprep.mubr.msk.f32.mxu0 %vm2919_vm0, %v3785_v19  ;;  %2592 = vmatprep.mubr.msk.f32.mxu1 %vm2919_vm0, %v3785_v19 }
 0x732   : > { %v1309_v47 = vpop.f32.mrf.mxu0  ;;  %v1380_v49 = vpop.f32.mrf.mxu1 }
 0x733   : > { %v3553_v3 = vadd.f32 %v1309_v47, %v872_v44  ;;  %v3555_v4 = vadd.f32 %v1380_v49, %v874_v45  ;;  %v1742_v44 = vld [vmem:[#allocation7 + $0x590] sm:$0xff]  ;;  %v1737_v45 = vld [vmem:[#allocation7 + $0x568] sm:$0xff]  ;;  %v1739_v47 = vld [vmem:[#allocation7 + $0x578] sm:$0xff] }
 0x734   : > { %v1311_v5 = vpop.f32.mrf.mxu0  ;;  %v1382_v6 = vpop.f32.mrf.mxu1  ;;  %v1736_v49 = vld [vmem:[#allocation7 + $0x560] sm:$0xff] }
 0x735   : > { %v3557_v7 = vadd.f32 %v1311_v5, %v873_v1  ;;  %v3559_v8 = vadd.f32 %v1382_v6, %v875_v2  ;;  %v1738_v1 = vld [vmem:[#allocation7 + $0x570] sm:$0xff]  ;;  %v1733_v2 = vld [vmem:[#allocation7 + $0x548] sm:$0xff]  ;;  %v1735_v5 = vld [vmem:[#allocation7 + $0x558] sm:$0xff] }
 0x736   : > { %v1732_v6 = vld [vmem:[#allocation7 + $0x540] sm:$0xff] }
 0x753   : > { %v1529_v9 = vpop.f32.mrf.mxu1  ;;  %v1458_v13 = vpop.f32.mrf.mxu0 }
 0x754   : > { %2591 = vmatpush3.msra.mxu1 %v1529_v9  ;;  %v1734_v9 = vld [vmem:[#allocation7 + $0x550] sm:$0xff] }
 0x755   : > { %v1531_v11 = vpop.f32.mrf.mxu1  ;;  %v3563_v14 = vpop.f32.mrf.mxu0  ;;  %1827 = vmatprep.subr.mxu1 %v1755_v62  ;;  %v1717_v62 = vld [vmem:[#allocation7 + $0x4c8] sm:$0xff] }
 0x756   : > { %v1534_v12 = vadd.f32 %v3787_v26, %v1531_v11  ;;  %v1729_v11 = vld [vmem:[#allocation7 + $0x528] sm:$0xff] }
 0x758   : > { %2586 = vmatpush3.xpose.msra.mxu0 %v1534_v12  ;;  %v1731_v12 = vld [vmem:[#allocation7 + $0x538] sm:$0xff] }
 0x759   : > { %1756 = vmatprep.subr.mxu0 %v1753_v28  ;;  %v1722_v28 = vld [vmem:[#allocation7 + $0x4f0] sm:$0xff] }
 0x75b   : > { %2588 = vmatmul.mubr.f32.vlgmr.msra.gmra.mxu0 %v1458_v13  ;;  %v1728_v13 = vld [vmem:[#allocation7 + $0x520] sm:$0xff] }
 0x75c   : > { %1820 = vmatprep.mubr.f32.mxu0 %v3785_v19  ;;  %1757 = vmatpush1.msra.mxu0 %v1752_v29  ;;  %v1719_v29 = vld [vmem:[#allocation7 + $0x4d8] sm:$0xff] }
 0x75d   : > { %1758 = vmatprep.subr.mxu0 %v1749_v33  ;;  %v1718_v33 = vld [vmem:[#allocation7 + $0x4d0] sm:$0xff] }
 0x75e   : > { %1759 = vmatpush1.msra.mxu0 %v1748_v35  ;;  %v1715_v35 = vld [vmem:[#allocation7 + $0x4b8] sm:$0xff] }
 0x75f   : > { %1760 = vmatprep.subr.mxu0 %v1745_v37  ;;  %v1714_v37 = vld [vmem:[#allocation7 + $0x4b0] sm:$0xff] }
 0x760   : > { %1761 = vmatpush1.msra.mxu0 %v1744_v39  ;;  %v1711_v39 = vld [vmem:[#allocation7 + $0x498] sm:$0xff] }
 0x761   : > { %1762 = vmatprep.subr.mxu0 %v1741_v41  ;;  %v1710_v41 = vld [vmem:[#allocation7 + $0x490] sm:$0xff] }
 0x762   : > { %1763 = vmatpush1.msra.mxu0 %v1740_v43  ;;  %v1707_v43 = vld [vmem:[#allocation7 + $0x478] sm:$0xff] }
 0x763   : > { %1764 = vmatprep.subr.mxu0 %v1737_v45  ;;  %v1706_v45 = vld [vmem:[#allocation7 + $0x470] sm:$0xff] }
 0x764   : > { %1765 = vmatpush1.msra.mxu0 %v1736_v49  ;;  %v1703_v49 = vld [vmem:[#allocation7 + $0x458] sm:$0xff] }
 0x765   : > { %1766 = vmatprep.subr.mxu0 %v1733_v2  ;;  %v1702_v2 = vld [vmem:[#allocation7 + $0x450] sm:$0xff] }
 0x766   : > { %1767 = vmatpush1.msra.mxu0 %v1732_v6  ;;  %v1699_v6 = vld [vmem:[#allocation7 + $0x438] sm:$0xff] }
 0x767   : > { %1768 = vmatprep.subr.mxu0 %v1729_v11  ;;  %v1698_v11 = vld [vmem:[#allocation7 + $0x430] sm:$0xff] }
 0x768   : > { %1769 = vmatpush1.msra.mxu0 %v1728_v13  ;;  %v1695_v13 = vld [vmem:[#allocation7 + $0x418] sm:$0xff] }
 0x81b   : > { %v1601_v15 = vpop.f32.mrf.mxu0 }
 0x81c   : > { %v1605_v16 = vsel %vm579_vm1, %v1601_v15, -inf }
 0x81d   : > { %1606 = vmax.xlane.f32.xlu0 %v1605_v16  ;;  %v2589_v18 = vpop.f32.mrf.mxu0  ;;  %v1725_v16 = vld [vmem:[#allocation7 + $0x508] sm:$0xff] }
 0x81e   : > { %v1727_v18 = vld [vmem:[#allocation7 + $0x518] sm:$0xff]  ;;  %1770 = vmatprep.subr.mxu0 %v1725_v16  ;;  %v1694_v16 = vld [vmem:[#allocation7 + $0x410] sm:$0xff] }
 0x8a6   : > { %v1607_v20 = vpop.xlane.xlu0 %1606 }
 0x8a7   : > { %v1608_v21 = vsub.f32 %v1601_v15, %v1607_v20  ;;  %v1730_v15 = vld [vmem:[#allocation7 + $0x530] sm:$0xff]  ;;  %v1724_v20 = vld [vmem:[#allocation7 + $0x500] sm:$0xff] }
 0x8a8   : > { %1771 = vmatpush1.msra.mxu0 %v1724_v20 }
 0x8a9   : > { %v1609_v22 = vmul.f32 1.442695, %v1608_v21  ;;  %v1726_v21 = vld [vmem:[#allocation7 + $0x510] sm:$0xff] }
 0x8ab   : > { %2687 = vpow2.f32 %v1609_v22  ;;  %v1721_v22 = vld [vmem:[#allocation7 + $0x4e8] sm:$0xff] }
 0x8ac   : > { %1772 = vmatprep.subr.mxu0 %v1721_v22 }
 0x8b8   : > { %v2688_v24 = vpop.eup %2687 }
 0x8b9   : > { %2593 = vmatmul.mubr.msk.f32.vlgmr.msra.gmra.mxu1 %vm579_vm1, %v2688_v24  ;;  %v1611_v26 = vsel %vm579_vm1, %v2688_v24, 0.0  ;;  %v1723_v24 = vld [vmem:[#allocation7 + $0x4f8] sm:$0xff] }
 0x8ba   : > { %1612 = vadd.xlane.f32.xlu1 %v1611_v26  ;;  %1891 = vmatprep.mubr.f32.mxu1 %v3785_v19  ;;  %v1720_v26 = vld [vmem:[#allocation7 + $0x4e0] sm:$0xff] }
 0x8bb   : > { %1828 = vmatpush1.msra.mxu1 %v1754_v31  ;;  %v1716_v31 = vld [vmem:[#allocation7 + $0x4c0] sm:$0xff]  ;;  %1773 = vmatpush1.msra.mxu0 %v1720_v26 }
 0x8bc   : > { %1829 = vmatprep.subr.mxu1 %v1751_v34  ;;  %v1713_v34 = vld [vmem:[#allocation7 + $0x4a8] sm:$0xff]  ;;  %1774 = vmatprep.subr.mxu0 %v1717_v62  ;;  %v2742_v62 = vld [vmem:[#allocation5 + $0x90] sm:$0xff] }
 0x8bd   : > { %1830 = vmatpush1.msra.mxu1 %v1750_v36  ;;  %v1712_v36 = vld [vmem:[#allocation7 + $0x4a0] sm:$0xff]  ;;  %1775 = vmatpush1.msra.mxu0 %v1716_v31  ;;  %v2744_v31 = vld [vmem:[#allocation5 + $0x78] sm:$0xff] }
 0x8be   : > { %1831 = vmatprep.subr.mxu1 %v1747_v38  ;;  %v1709_v38 = vld [vmem:[#allocation7 + $0x488] sm:$0xff]  ;;  %1776 = vmatprep.subr.mxu0 %v1713_v34  ;;  %v2746_v34 = vld [vmem:[#allocation5 + $0x70] sm:$0xff] }
 0x8bf   : > { %1832 = vmatpush1.msra.mxu1 %v1746_v40  ;;  %v1708_v40 = vld [vmem:[#allocation7 + $0x480] sm:$0xff]  ;;  %1777 = vmatpush1.msra.mxu0 %v1712_v36  ;;  %v2748_v36 = vld [vmem:[#allocation5 + $0x58] sm:$0xff] }
 0x8c0   : > { %1833 = vmatprep.subr.mxu1 %v1743_v42  ;;  %v1705_v42 = vld [vmem:[#allocation7 + $0x468] sm:$0xff]  ;;  %1778 = vmatprep.subr.mxu0 %v1709_v38  ;;  %v2750_v38 = vld [vmem:[#allocation5 + $0x50] sm:$0xff] }
 0x8c1   : > { %1834 = vmatpush1.msra.mxu1 %v1742_v44  ;;  %v1704_v44 = vld [vmem:[#allocation7 + $0x460] sm:$0xff]  ;;  %1779 = vmatpush1.msra.mxu0 %v1708_v40  ;;  %v2751_v40 = vld [vmem:[#allocation5 + $0x28] sm:$0xff] }
 0x8c2   : > { %1835 = vmatprep.subr.mxu1 %v1739_v47  ;;  %1780 = vmatprep.subr.mxu0 %v1705_v42  ;;  %v1701_v47 = vld [vmem:[#allocation7 + $0x448] sm:$0xff]  ;;  %v2753_v42 = vld [vmem:[#allocation5 + $0x20] sm:$0xff] }
 0x8c3   : > { %1836 = vmatpush1.msra.mxu1 %v1738_v1  ;;  %1781 = vmatpush1.msra.mxu0 %v1704_v44  ;;  %v1700_v1 = vld [vmem:[#allocation7 + $0x440] sm:$0xff]  ;;  %v2755_v44 = vld [vmem:[#allocation5 + $0x8] sm:$0xff] }
 0x8c4   : > { %1837 = vmatprep.subr.mxu1 %v1735_v5  ;;  %1782 = vmatprep.subr.mxu0 %v1701_v47  ;;  %v1697_v5 = vld [vmem:[#allocation7 + $0x428] sm:$0xff] }
 0x8c5   : > { %1838 = vmatpush1.msra.mxu1 %v1734_v9  ;;  %1783 = vmatpush1.msra.mxu0 %v1700_v1  ;;  %v1696_v9 = vld [vmem:[#allocation7 + $0x420] sm:$0xff]  ;;  %v2758_v1 = vld [vmem:[#allocation5 + $0x10] sm:$0xff] }
 0x8c6   : > { %1839 = vmatprep.subr.mxu1 %v1731_v12  ;;  %1784 = vmatprep.subr.mxu0 %v1697_v5  ;;  %v1693_v12 = vld [vmem:[#allocation7 + $0x408] sm:$0xff] }
 0x8c7   : > { %1840 = vmatpush1.msra.mxu1 %v1730_v15  ;;  %1785 = vmatpush1.msra.mxu0 %v1696_v9  ;;  %v1692_v15 = vld [vmem:[#allocation7 + $0x400] sm:$0xff] }
 0x8c8   : > { %1841 = vmatprep.subr.mxu1 %v1727_v18  ;;  %1786 = vmatprep.subr.mxu0 %v1693_v12 }
 0x8c9   : > { %1842 = vmatpush1.msra.mxu1 %v1726_v21  ;;  %1787 = vmatpush1.msra.mxu0 %v1692_v15 }
 0x8ca   : > { %1843 = vmatprep.subr.mxu1 %v1723_v24  ;;  %1905 = vmatprep.subr.mxu0 %v3408_v61  ;;  %v3795_v61 = vld [vmem:[#allocation12_spill] sm:$0xff] }
 0x8cb   : > { %1844 = vmatpush1.msra.mxu1 %v1722_v28 }
 0x8cc   : > { %1845 = vmatprep.subr.mxu1 %v1719_v29  ;;  %v2743_v29 = vld [vmem:[#allocation5 + $0x68] sm:$0xff] }
 0x8cd   : > { %1846 = vmatpush1.msra.mxu1 %v1718_v33  ;;  %v2745_v33 = vld [vmem:[#allocation5 + $0x60] sm:$0xff] }
 0x8ce   : > { %1847 = vmatprep.subr.mxu1 %v1715_v35  ;;  %v2747_v35 = vld [vmem:[#allocation5 + $0x48] sm:$0xff] }
 0x8cf   : > { %1848 = vmatpush1.msra.mxu1 %v1714_v37  ;;  %v2749_v37 = vld [vmem:[#allocation5 + $0x40] sm:$0xff] }
 0x8d0   : > { %1849 = vmatprep.subr.mxu1 %v1711_v39  ;;  %v2541_v39 = vld [vmem:[%s3090_s8 + $0x18] sm:$0xff]  ;;  %s2844_s8 = sshll.u32 %s2920_s13, 4  ;;  %s2845_s8 = int_to_ptr.vmem [resolvable:$false] %s2844_s8 }
 0x8d1   : > { %1850 = vmatpush1.msra.mxu1 %v1710_v41  ;;  %v2752_v41 = vld [vmem:[#allocation5 + $0x38] sm:$0xff]  ;;  %s2846_s29 = scalar_lea.vmem %s2845_s8, 1024  ;;  %p2847_p12 = scmp.lt.s32.totalorder %s2435_s25, %s2845_s8 }
 0x8d2   : > { %1851 = vmatprep.subr.mxu1 %v1707_v43  ;;  %v2754_v43 = vld [vmem:[#allocation5 + $0x30] sm:$0xff]  ;;  %p2848_p9 = scmp.lt.s32.totalorder %s2846_s29, %s2840_s11 }
 0x8d3   : > { %1852 = vmatpush1.msra.mxu1 %v1706_v45  ;;  %v2756_v45 = vld [vmem:[#allocation5 + $0x18] sm:$0xff] }
 0x8d4   : > { %1853 = vmatprep.subr.mxu1 %v1703_v49  ;;  %v2757_v49 = vld [vmem:[#allocation5] sm:$0xff]  ;;  %p2849_p10 = por %p2848_p9, %p2847_p12 }
 0x8d5   : > { %1854 = vmatpush1.msra.mxu1 %v1702_v2 }
 0x8d6   : > { %1855 = vmatprep.subr.mxu1 %v1699_v6  ;;  %p2850_p1 = pnand %p2849_p10, %p2843_p11 }
 0x8d7   : > { %1856 = vmatpush1.msra.mxu1 %v1698_v11 }
 0x8d8   : > { %1857 = vmatprep.subr.mxu1 %v1695_v13 }
 0x8d9   : > { %1858 = vmatpush1.msra.mxu1 %v1694_v16 }
 0x8da   : > { %1976 = vmatprep.subr.mxu1 %v3411_v60  ;;  %v3796_v60 = vld [vmem:[#allocation15_spill] sm:$0xff] }
 0x943   : > { %v1613_v18 = vpop.xlane.xlu1 %1612 }
 0x944   : > { %2689 = vrcp.f32 %v1613_v18 }
 0x951   : > { %v2690_v20 = vpop.eup %2689 }
 0x979   : > { %v1683_v21 = vpop.f32.mrf.mxu1 }
 0x97a   : > { %v1688_v22 = vmul.f32 %v2690_v20, %v1683_v21  ;;  %v2759_v20 = vld [vmem:[%s3685_s2] ss:$0 sm:$0xff] }
 0x97b   : > { %v2594_v24 = vpop.f32.mrf.mxu1 }
 0x97c   : > { %v3572_v26 = vadd.f32 %v1688_v22, %v3563_v14  ;;  %v2741_v14 = vld [vmem:[#allocation5 + $0x80] sm:$0xff] }
 0x97e   : > { %v1690_v28 = vmax.f32 %v3572_v26, 0.0  ;;  %v1904_v47 = vadd.f32 %v2541_v39, %v3572_v26  ;;  %v2234_v39 = vld [vmem:[#allocation7 + $0x6e8] sm:$0xff] }
 0x980   : > { %1821 = vmatmul.mubr.f32.vlgmr.msra.gmra.mxu0 %v1690_v28  ;;  %1892 = vmatmul.mubr.f32.vlgmr.msra.gmra.mxu1 %v1690_v28 }
 0x981   : > { %1906 = vmatpush1.msra.mxu0 %v3418_v51  ;;  %1977 = vmatpush1.msra.mxu1 %v3421_v59  ;;  %v3797_v51 = vld [vmem:[#allocation13_spill] sm:$0xff] }
 0x982   : > { %1907 = vmatprep.subr.mxu0 %v3424_v46  ;;  %1978 = vmatprep.subr.mxu1 %v3427_v57  ;;  %v3798_v59 = vld [vmem:[#allocation17_spill] sm:$0xff]  ;;  %v3799_v46 = vld [vmem:[#allocation14_spill] sm:$0xff]  ;;  %v3800_v57 = vld [vmem:[#allocation19_spill] sm:$0xff] }
 0x983   : > { %1908 = vmatpush1.msra.mxu0 %v3430_v32  ;;  %1979 = vmatpush1.msra.mxu1 %v3433_v52  ;;  %v3801_v32 = vld [vmem:[#allocation16_spill] sm:$0xff] }
 0x984   : > { %1909 = vmatprep.subr.mxu0 %v3436_v10  ;;  %1980 = vmatprep.subr.mxu1 %v3439_v17  ;;  %v2725_v52 = vld [vmem:[#allocation5 + $0x120] sm:$0xff]  ;;  %v2726_v10 = vld [vmem:[#allocation5 + $0x108] sm:$0xff] }
 0x985   : > { %1910 = vmatpush1.msra.mxu0 %v3442_v23  ;;  %1981 = vmatpush1.msra.mxu1 %v3445_v25  ;;  %v2727_v17 = vld [vmem:[#allocation5 + $0x100] sm:$0xff]  ;;  %v2728_v23 = vld [vmem:[#allocation5 + $0xe8] sm:$0xff] }
 0x986   : > { %1911 = vmatprep.subr.mxu0 %v3448_v27  ;;  %1982 = vmatprep.subr.mxu1 %v3451_v30  ;;  %v2729_v25 = vld [vmem:[#allocation5 + $0xe0] sm:$0xff]  ;;  %v2730_v27 = vld [vmem:[#allocation5 + $0xf0] sm:$0xff]  ;;  %v2731_v30 = vld [vmem:[#allocation5 + $0xc8] sm:$0xff] }
 0x987   : > { %1912 = vmatpush1.msra.mxu0 %v3454_v58  ;;  %1983 = vmatpush1.msra.mxu1 %v3457_v50  ;;  %v2732_v58 = vld [vmem:[#allocation5 + $0xd8] sm:$0xff]  ;;  %v2733_v50 = vld [vmem:[#allocation5 + $0xc0] sm:$0xff] }
 0x988   : > { %1913 = vmatprep.subr.mxu0 %v3460_v55  ;;  %1984 = vmatprep.subr.mxu1 %v3795_v61  ;;  %v2734_v55 = vld [vmem:[#allocation5 + $0xd0] sm:$0xff] }
 0x989   : > { %1914 = vmatpush1.msra.mxu0 %v3796_v60  ;;  %1985 = vmatpush1.msra.mxu1 %v3797_v51  ;;  %v2266_v51 = vld [vmem:[#allocation7 + $0x7e8] sm:$0xff] }
 0x98a   : > { %1915 = vmatprep.subr.mxu0 %v3798_v59  ;;  %1986 = vmatprep.subr.mxu1 %v3475_v0  ;;  %v2738_v0 = vld [vmem:[#allocation5 + $0xb0] sm:$0xff]  ;;  %v2268_v59 = vld [vmem:[#allocation7 + $0x7f8] sm:$0xff] }
 0x98b   : > { %1916 = vmatpush1.msra.mxu0 %v3799_v46  ;;  %1987 = vmatpush1.msra.mxu1 %v3800_v57  ;;  %v2265_v46 = vld [vmem:[#allocation7 + $0x7e0] sm:$0xff]  ;;  %v2267_v57 = vld [vmem:[#allocation7 + $0x7f0] sm:$0xff] }
 0x98c   : > { %1917 = vmatprep.subr.mxu0 %v3484_v48  ;;  %1988 = vmatprep.subr.mxu1 %v3801_v32  ;;  %v2735_v48 = vld [vmem:[#allocation5 + $0xa8] sm:$0xff] }
 0x98d   : > { %1918 = vmatpush1.msra.mxu0 %v2725_v52  ;;  %1989 = vmatpush1.msra.mxu1 %v3491_v63  ;;  %v2736_v63 = vld [vmem:[#allocation5 + $0xb8] sm:$0xff]  ;;  %v2262_v32 = vld [vmem:[#allocation7 + $0x7c8] sm:$0xff] }
 0x98e   : > { %1919 = vmatprep.subr.mxu0 %v2726_v10  ;;  %1990 = vmatprep.subr.mxu1 %v3495_v53  ;;  %v2740_v53 = vld [vmem:[#allocation5 + $0x98] sm:$0xff]  ;;  %v2261_v10 = vld [vmem:[#allocation7 + $0x7c0] sm:$0xff] }
 0x98f   : > { %1920 = vmatpush1.msra.mxu0 %v2727_v17  ;;  %1991 = vmatpush1.msra.mxu1 %v3499_v54  ;;  %v2737_v54 = vld [vmem:[#allocation5 + $0xa0] sm:$0xff]  ;;  %v2264_v52 = vld [vmem:[#allocation7 + $0x7d8] sm:$0xff]  ;;  %v2263_v17 = vld [vmem:[#allocation7 + $0x7d0] sm:$0xff] }
 0x990   : > { %1921 = vmatprep.subr.mxu0 %v2728_v23  ;;  %1992 = vmatprep.subr.mxu1 %v3503_v56  ;;  %v2739_v56 = vld [vmem:[#allocation5 + $0x88] sm:$0xff] }
 0x991   : > { %1922 = vmatpush1.msra.mxu0 %v2729_v25  ;;  %1993 = vmatpush1.msra.mxu1 %v2730_v27  ;;  %v2258_v23 = vld [vmem:[#allocation7 + $0x7a8] sm:$0xff]  ;;  %v2260_v25 = vld [vmem:[#allocation7 + $0x7b8] sm:$0xff]  ;;  %v2257_v27 = vld [vmem:[#allocation7 + $0x7a0] sm:$0xff] }
 0x992   : > { %1923 = vmatprep.subr.mxu0 %v2731_v30  ;;  %1994 = vmatprep.subr.mxu1 %v2732_v58  ;;  %v2259_v30 = vld [vmem:[#allocation7 + $0x7b0] sm:$0xff]  ;;  %v2256_v58 = vld [vmem:[#allocation7 + $0x798] sm:$0xff] }
 0x993   : > { %1924 = vmatpush1.msra.mxu0 %v2733_v50  ;;  %1995 = vmatpush1.msra.mxu1 %v2734_v55  ;;  %v2253_v50 = vld [vmem:[#allocation7 + $0x780] sm:$0xff]  ;;  %v2255_v55 = vld [vmem:[#allocation7 + $0x790] sm:$0xff] }
 0x994   : > { %1925 = vmatprep.subr.mxu0 %v2735_v48  ;;  %1996 = vmatprep.subr.mxu1 %v2736_v63  ;;  %v2250_v48 = vld [vmem:[#allocation7 + $0x768] sm:$0xff]  ;;  %v2252_v63 = vld [vmem:[#allocation7 + $0x778] sm:$0xff] }
 0x995   : > { %1926 = vmatpush1.msra.mxu0 %v2737_v54  ;;  %1997 = vmatpush1.msra.mxu1 %v2738_v0  ;;  %v2249_v54 = vld [vmem:[#allocation7 + $0x760] sm:$0xff]  ;;  %v2251_v0 = vld [vmem:[#allocation7 + $0x770] sm:$0xff] }
 0x996   : > { %1927 = vmatprep.subr.mxu0 %v2739_v56  ;;  %1998 = vmatprep.subr.mxu1 %v2740_v53  ;;  %v2246_v56 = vld [vmem:[#allocation7 + $0x748] sm:$0xff]  ;;  %v2248_v53 = vld [vmem:[#allocation7 + $0x758] sm:$0xff] }
 0x997   : > { %1928 = vmatpush1.msra.mxu0 %v2741_v14  ;;  %1999 = vmatpush1.msra.mxu1 %v2742_v62  ;;  %v2245_v14 = vld [vmem:[#allocation7 + $0x740] sm:$0xff]  ;;  %v2247_v62 = vld [vmem:[#allocation7 + $0x750] sm:$0xff] }
 0x998   : > { %1929 = vmatprep.subr.mxu0 %v2743_v29  ;;  %2000 = vmatprep.subr.mxu1 %v2744_v31  ;;  %v2242_v29 = vld [vmem:[#allocation7 + $0x728] sm:$0xff]  ;;  %v2244_v31 = vld [vmem:[#allocation7 + $0x738] sm:$0xff] }
 0x999   : > { %1930 = vmatpush1.msra.mxu0 %v2745_v33  ;;  %2001 = vmatpush1.msra.mxu1 %v2746_v34  ;;  %v2241_v33 = vld [vmem:[#allocation7 + $0x720] sm:$0xff]  ;;  %v2243_v34 = vld [vmem:[#allocation7 + $0x730] sm:$0xff] }
 0x99a   : > { %1931 = vmatprep.subr.mxu0 %v2747_v35  ;;  %2002 = vmatprep.subr.mxu1 %v2748_v36  ;;  %v2238_v35 = vld [vmem:[#allocation7 + $0x708] sm:$0xff]  ;;  %v2240_v36 = vld [vmem:[#allocation7 + $0x718] sm:$0xff] }
 0x99b   : > { %1932 = vmatpush1.msra.mxu0 %v2749_v37  ;;  %2003 = vmatpush1.msra.mxu1 %v2750_v38  ;;  %v2237_v37 = vld [vmem:[#allocation7 + $0x700] sm:$0xff]  ;;  %v2239_v38 = vld [vmem:[#allocation7 + $0x710] sm:$0xff] }
 0x99c   : > { %1933 = vmatprep.subr.mxu0 %v2751_v40  ;;  %2004 = vmatprep.subr.mxu1 %v2752_v41  ;;  %v2236_v40 = vld [vmem:[#allocation7 + $0x6f8] sm:$0xff]  ;;  %v2233_v41 = vld [vmem:[#allocation7 + $0x6e0] sm:$0xff] }
 0x99d   : > { %1934 = vmatpush1.msra.mxu0 %v2753_v42  ;;  %2005 = vmatpush1.msra.mxu1 %v2754_v43  ;;  %v2235_v42 = vld [vmem:[#allocation7 + $0x6f0] sm:$0xff]  ;;  %v2230_v43 = vld [vmem:[#allocation7 + $0x6c8] sm:$0xff] }
 0x99e   : > { %1935 = vmatprep.subr.mxu0 %v2755_v44  ;;  %2006 = vmatprep.subr.mxu1 %v2756_v45  ;;  %v2232_v44 = vld [vmem:[#allocation7 + $0x6d8] sm:$0xff]  ;;  %v2229_v45 = vld [vmem:[#allocation7 + $0x6c0] sm:$0xff] }
 0x99f   : > { %1936 = vmatpush1.msra.mxu0 %v2757_v49  ;;  %1969 = vmatprep.mubr.f32.mxu0 %v3785_v19  ;;  %v2226_v49 = vld [vmem:[#allocation7 + $0x6a8] sm:$0xff] }
 0x9a0   : > { %2007 = vmatpush1.msra.mxu1 %v2758_v1  ;;  %2040 = vmatprep.mubr.f32.mxu1 %v3785_v19  ;;  %v2228_v1 = vld [vmem:[#allocation7 + $0x6b8] sm:$0xff] }
 0x9a1   : > { %1970 = vmatmul.mubr.f32.vlgmr.msra.gmra.mxu0 %v1904_v47  ;;  %2041 = vmatmul.mubr.f32.vlgmr.msra.gmra.mxu1 %v1904_v47  ;;  %v2231_v47 = vld [vmem:[#allocation7 + $0x6d0] sm:$0xff] }
 0x9a2   : > { %2600 = vmatprep.subr.mxu1 %v3785_v19  ;;  %2595 = vmatprep.subr.mxu0 %v3785_v19 }
 0x9a3   : > { %2597 = vmatprep.mubr.msk.f32.mxu0 %vm2919_vm0, %v3785_v19  ;;  %2602 = vmatprep.mubr.msk.f32.mxu1 %vm2919_vm0, %v3785_v19 }
 0xa40   : > { %v1822_v2 = vpop.f32.mrf.mxu0  ;;  %v1893_v5 = vpop.f32.mrf.mxu1 }
 0xa41   : > { %v3614_v6 = vadd.f32 %v1822_v2, %v3553_v3  ;;  %v3617_v9 = vadd.f32 %v1893_v5, %v3555_v4  ;;  %v2225_v2 = vld [vmem:[#allocation7 + $0x6a0] sm:$0xff]  ;;  %v2227_v5 = vld [vmem:[#allocation7 + $0x6b0] sm:$0xff] }
 0xa42   : > { %v1824_v11 = vpop.f32.mrf.mxu0  ;;  %v1895_v12 = vpop.f32.mrf.mxu1 }
 0xa43   : > { %v3620_v13 = vadd.f32 %v1824_v11, %v3557_v7  ;;  %v3623_v15 = vadd.f32 %v1895_v12, %v3559_v8  ;;  %v2222_v11 = vld [vmem:[#allocation7 + $0x688] sm:$0xff]  ;;  %v2224_v12 = vld [vmem:[#allocation7 + $0x698] sm:$0xff] }
 0xa61   : > { %v2042_v16 = vpop.f32.mrf.mxu1  ;;  %v1971_v21 = vpop.f32.mrf.mxu0 }
 0xa62   : > { %2601 = vmatpush3.msra.mxu1 %v2042_v16  ;;  %v2221_v16 = vld [vmem:[#allocation7 + $0x680] sm:$0xff] }
 0xa63   : > { %v2044_v18 = vpop.f32.mrf.mxu1  ;;  %v3629_v4 = vpop.f32.mrf.mxu0  ;;  %2340 = vmatprep.subr.mxu1 %v2268_v59  ;;  %v2206_v59 = vld [vmem:[#allocation7 + $0x608] sm:$0xff] }
 0xa64   : > { %v2047_v3 = vadd.f32 %v2759_v20, %v2044_v18  ;;  %v2223_v18 = vld [vmem:[#allocation7 + $0x690] sm:$0xff]  ;;  %v2218_v20 = vld [vmem:[#allocation7 + $0x668] sm:$0xff] }
 0xa66   : > { %2596 = vmatpush3.xpose.msra.mxu0 %v2047_v3  ;;  %v2220_v3 = vld [vmem:[#allocation7 + $0x678] sm:$0xff] }
 0xa67   : > { %2269 = vmatprep.subr.mxu0 %v2266_v51  ;;  %v2211_v51 = vld [vmem:[#allocation7 + $0x630] sm:$0xff] }
 0xa69   : > { %2598 = vmatmul.mubr.f32.vlgmr.msra.gmra.mxu0 %v1971_v21  ;;  %v2217_v21 = vld [vmem:[#allocation7 + $0x660] sm:$0xff] }
 0xa6a   : > { %2333 = vmatprep.mubr.f32.mxu0 %v3785_v19  ;;  %2270 = vmatpush1.msra.mxu0 %v2265_v46  ;;  %v2208_v46 = vld [vmem:[#allocation7 + $0x618] sm:$0xff] }
 0xa6b   : > { %2271 = vmatprep.subr.mxu0 %v2262_v32  ;;  %v2207_v32 = vld [vmem:[#allocation7 + $0x610] sm:$0xff] }
 0xa6c   : > { %2272 = vmatpush1.msra.mxu0 %v2261_v10 }
 0xa6d   : > { %2273 = vmatprep.subr.mxu0 %v2258_v23 }
 0xa6e   : > { %2274 = vmatpush1.msra.mxu0 %v2257_v27 }
 0xb29   : > { %v2114_v7 = vpop.f32.mrf.mxu0 }
 0xb2a   : > { %v2118_v22 = vsel %vm579_vm1, %v2114_v7, -inf }
 0xb2b   : > { %2119 = vmax.xlane.f32.xlu0 %v2118_v22  ;;  %v2599_v8 = vpop.f32.mrf.mxu0  ;;  %v2214_v22 = vld [vmem:[#allocation7 + $0x648] sm:$0xff] }
 0xb2c   : > { %v2216_v8 = vld [vmem:[#allocation7 + $0x658] sm:$0xff] }
 0xbb4   : > { %v2120_v24 = vpop.xlane.xlu0 %2119 }
 0xbb5   : > { %v2121_v26 = vsub.f32 %v2114_v7, %v2120_v24  ;;  %v2219_v7 = vld [vmem:[#allocation7 + $0x670] sm:$0xff]  ;;  %v2213_v24 = vld [vmem:[#allocation7 + $0x640] sm:$0xff] }
 0xbb7   : > { %v2122_v28 = vmul.f32 1.442695, %v2121_v26  ;;  %v2215_v26 = vld [vmem:[#allocation7 + $0x650] sm:$0xff] }
 0xbb9   : > { %2691 = vpow2.f32 %v2122_v28  ;;  %v2210_v28 = vld [vmem:[#allocation7 + $0x628] sm:$0xff] }
 0xbc6   : > { %v2692_v61 = vpop.eup %2691 }
 0xbc7   : > { %2603 = vmatmul.mubr.msk.f32.vlgmr.msra.gmra.mxu1 %vm579_vm1, %v2692_v61  ;;  %v2124_v60 = vsel %vm579_vm1, %v2692_v61, 0.0  ;;  %v2212_v61 = vld [vmem:[#allocation7 + $0x638] sm:$0xff] }
 0xbc8   : > { %2125 = vadd.xlane.f32.xlu1 %v2124_v60  ;;  %2404 = vmatprep.mubr.f32.mxu1 %v3785_v19  ;;  %v2254_v19 = vld [vmem:[#allocation7 + $0x788] sm:$0xff]  ;;  %v2209_v60 = vld [vmem:[#allocation7 + $0x620] sm:$0xff] }
 0xbc9   : > { %2341 = vmatpush1.msra.mxu1 %v2267_v57  ;;  %2275 = vmatprep.subr.mxu0 %v2254_v19  ;;  %v2205_v57 = vld [vmem:[#allocation7 + $0x600] sm:$0xff] }
 0xbca   : > { %2342 = vmatprep.subr.mxu1 %v2264_v52  ;;  %2276 = vmatpush1.msra.mxu0 %v2253_v50 }
 0xbcb   : > { %2343 = vmatpush1.msra.mxu1 %v2263_v17  ;;  %2277 = vmatprep.subr.mxu0 %v2250_v48 }
 0xbcc   : > { %2344 = vmatprep.subr.mxu1 %v2260_v25  ;;  %2278 = vmatpush1.msra.mxu0 %v2249_v54 }
 0xbcd   : > { %2345 = vmatpush1.msra.mxu1 %v2259_v30  ;;  %2279 = vmatprep.subr.mxu0 %v2246_v56 }
 0xbce   : > { %2346 = vmatprep.subr.mxu1 %v2256_v58  ;;  %2280 = vmatpush1.msra.mxu0 %v2245_v14 }
 0xbcf   : > { %2347 = vmatpush1.msra.mxu1 %v2255_v55  ;;  %2281 = vmatprep.subr.mxu0 %v2242_v29 }
 0xbd0   : > { %2348 = vmatprep.subr.mxu1 %v2252_v63  ;;  %2282 = vmatpush1.msra.mxu0 %v2241_v33 }
 0xbd1   : > { %2349 = vmatpush1.msra.mxu1 %v2251_v0  ;;  %2283 = vmatprep.subr.mxu0 %v2238_v35 }
 0xbd2   : > { %2350 = vmatprep.subr.mxu1 %v2248_v53  ;;  %2284 = vmatpush1.msra.mxu0 %v2237_v37 }
 0xbd3   : > { %2351 = vmatpush1.msra.mxu1 %v2247_v62  ;;  %2285 = vmatprep.subr.mxu0 %v2234_v39 }
 0xbd4   : > { %2352 = vmatprep.subr.mxu1 %v2244_v31  ;;  %2286 = vmatpush1.msra.mxu0 %v2233_v41 }
 0xbd5   : > { %2353 = vmatpush1.msra.mxu1 %v2243_v34  ;;  %2287 = vmatprep.subr.mxu0 %v2230_v43 }
 0xbd6   : > { %2354 = vmatprep.subr.mxu1 %v2240_v36  ;;  %2288 = vmatpush1.msra.mxu0 %v2229_v45 }
 0xbd7   : > { %2355 = vmatpush1.msra.mxu1 %v2239_v38  ;;  %2289 = vmatprep.subr.mxu0 %v2226_v49 }
 0xbd8   : > { %2356 = vmatprep.subr.mxu1 %v2236_v40  ;;  %2290 = vmatpush1.msra.mxu0 %v2225_v2 }
 0xbd9   : > { %2357 = vmatpush1.msra.mxu1 %v2235_v42  ;;  %2291 = vmatprep.subr.mxu0 %v2222_v11 }
 0xbda   : > { %2358 = vmatprep.subr.mxu1 %v2232_v44  ;;  %2292 = vmatpush1.msra.mxu0 %v2221_v16 }
 0xbdb   : > { %2359 = vmatpush1.msra.mxu1 %v2231_v47  ;;  %2293 = vmatprep.subr.mxu0 %v2218_v20 }
 0xbdc   : > { %2360 = vmatprep.subr.mxu1 %v2228_v1  ;;  %2294 = vmatpush1.msra.mxu0 %v2217_v21 }
 0xbdd   : > { %2361 = vmatpush1.msra.mxu1 %v2227_v5  ;;  %2295 = vmatprep.subr.mxu0 %v2214_v22 }
 0xbde   : > { %2362 = vmatprep.subr.mxu1 %v2224_v12  ;;  %2296 = vmatpush1.msra.mxu0 %v2213_v24 }
 0xbdf   : > { %2363 = vmatpush1.msra.mxu1 %v2223_v18  ;;  %2297 = vmatprep.subr.mxu0 %v2210_v28 }
 0xbe0   : > { %2364 = vmatprep.subr.mxu1 %v2220_v3  ;;  %2298 = vmatpush1.msra.mxu0 %v2209_v60 }
 0xbe1   : > { %2365 = vmatpush1.msra.mxu1 %v2219_v7  ;;  %2299 = vmatprep.subr.mxu0 %v2206_v59 }
 0xbe2   : > { %2366 = vmatprep.subr.mxu1 %v2216_v8  ;;  %2300 = vmatpush1.msra.mxu0 %v2205_v57 }
 0xbe3   : > { %2367 = vmatpush1.msra.mxu1 %v2215_v26 }
 0xbe4   : > { %2368 = vmatprep.subr.mxu1 %v2212_v61 }
 0xbe5   : > { %2369 = vmatpush1.msra.mxu1 %v2211_v51 }
 0xbe6   : > { %2370 = vmatprep.subr.mxu1 %v2208_v46 }
 0xbe7   : > { %2371 = vmatpush1.msra.mxu1 %v2207_v32 }
 0xc51   : > { %v2126_v52 = vpop.xlane.xlu1 %2125 }
 0xc52   : > { %2693 = vrcp.f32 %v2126_v52 }
 0xc5f   : > { %v2694_v10 = vpop.eup %2693 }
 0xc87   : > { %v2196_v17 = vpop.f32.mrf.mxu1 }
 0xc88   : > { %v2201_v23 = vmul.f32 %v2694_v10, %v2196_v17 }
 0xc89   : > { %v2604_v25 = vpop.f32.mrf.mxu1 }
 0xc8a   : > { %v2202_v27 = vadd.f32 %v2201_v23, %v3629_v4 }
 0xc8c   : > { %v2203_v30 = vmax.f32 %v2202_v27, 0.0 }
 0xc8e   : > { %2334 = vmatmul.mubr.f32.vlgmr.msra.gmra.mxu0 %v2203_v30  ;;  %2405 = vmatmul.mubr.f32.vlgmr.msra.gmra.mxu1 %v2203_v30 }
 0xd4e   : > { %v2335_v19 = vpop.f32.mrf.mxu0  ;;  %v2406_v58 = vpop.f32.mrf.mxu1 }
 0xd4f   : > { %v2411_v50 = vadd.f32 %v2335_v19, %v3614_v6  ;;  %v2413_v55 = vadd.f32 %v2406_v58, %v3617_v9 }
 0xd50   : > { %v2337_v48 = vpop.f32.mrf.mxu0  ;;  %v2408_v63 = vpop.f32.mrf.mxu1 }
 0xd51   : > { %2415 = vst [vmem:[%s270_s16] sm:$0xff] %v2411_v50  ;;  %2417 = vst [vmem:[%s270_s16 + $0x10] sm:$0xff] %v2413_v55  ;;  %v2412_v4 = vadd.f32 %v2337_v48, %v3620_v13  ;;  %v2414_v54 = vadd.f32 %v2408_v63, %v3623_v15 }
 0xd53   : > { %2416 = vst [vmem:[%s270_s16 + $0x8] sm:$0xff] %v2412_v4  ;;  %2418 = vst [vmem:[%s270_s16 + $0x18] sm:$0xff] %v2414_v54 }
 0xd54   : > { %2853 = shalt.err (!%p2850_p1)
}
 0xd55   : > { %s2854_s7 = scalar_lea.hbm %s3646_s22, 512  ;;  %s2858_s17 = scalar_lea.hbm %s3688_s5, 1024 }
 0xd56   : > { %p2855_p5 = scmp.ne.s32.totalorder %s3646_s22, %s2854_s7  ;;  %p2859_p6 = scmp.lt.s32.totalorder %s3646_s22, %s3688_s5 }
 0xd57   : > { %p2860_p13 = scmp.lt.s32.totalorder %s2858_s17, %s2854_s7 }
 0xd58   : > { %p2856_p0 = pnand %p2855_p5, %p3802_p7 }
 0xd59   : > { %p2861_p8 = por %p2860_p13, %p2859_p6 }
 0xd5a   : > { %p2857_p2 = pneg %p2856_p0 }
 0xd5c   : > { %p2862_p3 = pnand %p2861_p8, %p2857_p2 }
 0xd5e   : > { %2865 = shalt.err (!%p2862_p3)
}
 0xd5f   : > { %2615 = dma.vmem_to_hbm [thread:$0]  (%p3802_p7), %s2435_s25, 512, %s3646_s22, %s2420_s14  }
 0xd60 PF: > { %s2446_s9 = sand.u32 1, %s2896_s18   ;;  %p3803_p4 = scmp.ne.s32.totalorder %s3742_s6, 0 }
 0xd61   : > { %p3804_p11 = scmp.ge.s32.totalorder %s2908_s21, 2  ;;  %s2447_s16 = scalar_lea.sflag [#allocation4], %s2446_s9 }
 0xd63   : > { %p2629_p12 = pnand %p3804_p11, %p3803_p4 }
 0xd65   : > { %p2630_p9 = pneg %p2629_p12 }
 0xd67   : > { %2891 = dma.done.wait (%p2630_p9), %s2447_s16, 512  }
 0xd68   : > { %2893 = vsyncadd (%p2630_p9), %s2447_s16, 4294966784  ;;  %p19_p10 = scmp.ge.s32.totalorder %s2976_s24, 4   ;;  %s3805_s18 = smov %s2900_s19 }
 0xd69   : > { %s3806_s19 = smov %s2904_s20  ;;  %s3807_s20 = smov %s2988_s27 }
 0xd6a   : > { %s3808_s21 = smov %s2976_s24  ;;  %21 = sbr.rel (!%p19_p10) target bundleno = 6 (0x6), region = 99 }
 0xd6f   :  { %2452 = vsyncpa [#allocation3], 1 }
 0xd70   :  { %2454 = vsyncpa [#allocation3 + $0x1], 1 }
 0xd71   :  { %2455 = vsyncpa [#allocation6], 1 }
 0xd72   :  { %2456 = vsyncpa [#allocation4], 1 }
 0xd73   :  { %2458 = vsyncpa [#allocation4 + $0x1], 1 }

</bundles_post_ra>
